<compile_context>
chip_gen: v7x
topology: tpu7x:2x2x1
jax: 0.10.0
libtpu: 0.0.40
codegen_flags: <defaults>
</compile_context>

<pallas_src>
import jax
import jax.numpy as jnp
from jax.experimental import pallas as pl
from jax.experimental.pallas import tpu as pltpu


def _round_up(n, m):
    return ((n + m - 1) // m) * m


def _cdiv(a, b):
    return (a + b - 1) // b


def _lanepad(n):
    return _round_up(n, 128)


# --------------------------------------------------------------------------- kernel
def ae2_kernel(x_ref, w1_ref, b1_ref, w2_ref, b2_ref, y_ref, z_ref):
    # Encoder: Z = relu(X @ W1 + b1)   -- MXU matmul + VPU elementwise
    z = jnp.dot(x_ref[...], w1_ref[...], preferred_element_type=jnp.float32)
    z = jnp.maximum(z + b1_ref[...], 0.0)
    z_ref[...] = z.astype(z_ref.dtype)

    # Decoder: Y = sigmoid(Z @ W2 + b2)  -- MXU matmul, stable sigmoid on the EUP.
    y = jnp.dot(z, w2_ref[...], preferred_element_type=jnp.float32)
    y = y + b2_ref[...]
    e = jnp.exp(-jnp.abs(y))                    # in (0, 1], never overflows
    inv = pl.reciprocal(1.0 + e, approx=True)   # argument in (1, 2], always finite
    y_ref[...] = (jnp.where(y >= 0.0, 1.0, e) * inv).astype(y_ref.dtype)


# ------------------------------------------------------------------ tiling decisions
def _tpu_budget():
    """(vmem_capacity_bytes, tensorcores_per_chip) with conservative fallbacks."""
    vmem_bytes = 128 << 20   # v5e / v6e default
    num_tc = 1
    try:
        info = pltpu.get_tpu_info()
        vmem_bytes = int(getattr(info, "vmem_capacity_bytes", vmem_bytes)) or vmem_bytes
    except Exception:
        pass
    try:
        kind = jax.devices()[0].device_kind.lower()
        if "v7" in kind:     # v7x: 2 TensorCores per chip, 64 MiB VMEM per TC
            num_tc = 2
            vmem_bytes = min(vmem_bytes, 64 << 20)
    except Exception:
        pass
    return vmem_bytes, num_tc


def _per_row_vmem_bytes(D_in, H, D_out):
    # f32, minor dims lane-padded to 128: double-buffered X/Y/Z tiles + in-kernel
    # f32 intermediates for z and y.
    return 4 * (2 * _lanepad(D_in) + 2 * _lanepad(H) + 2 * _lanepad(D_out)
                + _lanepad(H) + _lanepad(D_out))


def _choose_tiling(B, D_in, H, D_out, vmem_bytes, num_tc):
    per_row = _per_row_vmem_bytes(D_in, H, D_out)
    budget = int(vmem_bytes * 0.4)               # headroom for weights + compiler scratch
    tb_max = max(8, min(4096, (budget // per_row) // 8 * 8))

    B8 = _round_up(max(B, 8), 8)
    if num_tc >= 2:
        grid = max(2, _cdiv(B8, tb_max))
        if grid % 2:
            grid += 1                            # even grid -> both TCs equally loaded
    else:
        grid = max(1, _cdiv(B8, tb_max))         # 1 TC: grid is a serial loop, keep it minimal
    tb = _round_up(_cdiv(B8, grid), 8)
    return tb, grid


# --------------------------------------------------------------------------- wrapper
def _build_call(B_pad, tb, grid, D_in, H, D_out, vmem_limit, cost, single_buffer_weights):
    def resident(shape):
        idx = lambda i, _n=len(shape): (0,) * _n
        if single_buffer_weights:
            # Constant index_map -> block never changes; no point double-buffering it.
            return pl.BlockSpec(shape, idx, pipeline_mode=pl.Buffered(1))
        return pl.BlockSpec(shape, idx)

    f32 = jnp.float32
    return pl.pallas_call(
        ae2_kernel,
        out_shape=(
            jax.ShapeDtypeStruct((B_pad, D_out), f32),   # Y (unpadded feature dim)
            jax.ShapeDtypeStruct((B_pad, H), f32),       # Z (unpadded feature dim)
        ),
        grid_spec=pltpu.PrefetchScalarGridSpec(
            num_scalar_prefetch=0,
            grid=(grid,),
            in_specs=[
                pl.BlockSpec((tb, D_in), lambda i: (i, 0)),   # X tile over batch
                resident((D_in, H)),                          # W1 (full, resident)
                resident((1, H)),                             # b1
                resident((H, D_out)),                         # W2
                resident((1, D_out)),                         # b2
            ],
            out_specs=[
                pl.BlockSpec((tb, D_out), lambda i: (i, 0)),  # Y tile
                pl.BlockSpec((tb, H), lambda i: (i, 0)),      # Z tile
            ],
        ),
        compiler_params=pltpu.CompilerParams(
            dimension_semantics=("parallel",),
            vmem_limit_bytes=vmem_limit,
        ),
        cost_estimate=cost,
    )


def ae2_forward(x, w1, b1, w2, b2, *, tb=None):
    """Pallas forward pass of AE2. Returns (Y, Z) like the PyTorch module.

    x:  (B, D_in)  float32
    w1: (D_in, H)  float32   (transposed PyTorch enc weight)
    b1: (H,) or (1, H)
    w2: (H, D_out) float32   (transposed PyTorch dec weight)
    b2: (D_out,) or (1, D_out)
    """
    B, D_in = x.shape
    H = w1.shape[1]
    D_out = w2.shape[1]
    f32 = jnp.float32

    vmem_bytes, num_tc = _tpu_budget()
    if tb is None:
        tb, grid = _choose_tiling(B, D_in, H, D_out, vmem_bytes, num_tc)
    else:
        tb = _round_up(max(tb, 8), 8)
        grid = _cdiv(_round_up(max(B, 8), 8), tb)
        if num_tc >= 2 and grid > 1 and grid % 2:
            grid += 1
    B_pad = tb * grid

    # Batch padding with zero rows (results for those rows are sliced off).
    xp = x.astype(f32)
    if B_pad != B:
        xp = jnp.zeros((B_pad, D_in), f32).at[:B].set(xp)

    w1c = w1.astype(f32)
    w2c = w2.astype(f32)
    b1r = jnp.reshape(b1, (1, H)).astype(f32)
    b2r = jnp.reshape(b2, (1, D_out)).astype(f32)

    # Advisory cost estimate (exp + approx reciprocal per output element).
    flops = 2 * B_pad * (D_in * H + H * D_out)
    transcendentals = 2 * B_pad * D_out
    bytes_accessed = 4 * (B_pad * D_in + D_in * H + H + H * D_out + D_out
                          + B_pad * D_out + B_pad * H)
    cost = pl.CostEstimate(flops=flops, transcendentals=transcendentals,
                           bytes_accessed=bytes_accessed)

    # VMEM budget (lane padding accounted for), generation-aware ceiling.
    weight_bytes = 4 * (_round_up(D_in, 8) * _lanepad(H) + 8 * _lanepad(H)
                        + _round_up(H, 8) * _lanepad(D_out) + 8 * _lanepad(D_out))
    vmem_need = tb * _per_row_vmem_bytes(D_in, H, D_out) + 2 * weight_bytes
    vmem_limit = int(min(vmem_bytes * 3 // 4, max(16 << 20, 2 * vmem_need)))

    args = (xp, w1c, b1r, w2c, b2r)
    try:
        call = _build_call(B_pad, tb, grid, D_in, H, D_out, vmem_limit, cost,
                           single_buffer_weights=True)
        y_pad, z_pad = call(*args)
    except Exception:
        # Fallback if the installed JAX/Mosaic rejects pipeline_mode=pl.Buffered(1).
        call = _build_call(B_pad, tb, grid, D_in, H, D_out, vmem_limit, cost,
                           single_buffer_weights=False)
        y_pad, z_pad = call(*args)

    return y_pad[:B, :D_out], z_pad[:B, :H]


def ae2_reference(x, w1, b1, w2, b2):
    z = jnp.maximum(x @ w1 + jnp.reshape(b1, (1, -1)), 0.0)
    y = jax.nn.sigmoid(z @ w2 + jnp.reshape(b2, (1, -1)))
    return y, z


if __name__ == "__main__":
    # Small shapes consistent with the module; B deliberately not a power of two so the
    # ragged-batch / even-grid padding path is exercised.
    B, D_in, H, D_out = 200, 64, 32, 48

    key = jax.random.PRNGKey(0)
    kx, kw1, kb1, kw2, kb2 = jax.random.split(key, 5)

    # Deterministic parameter init (synthetic, PyTorch-Linear-like uniform fan-in scale).
    x = jax.random.normal(kx, (B, D_in), dtype=jnp.float32)
    lim1 = 1.0 / jnp.sqrt(D_in)
    w1 = jax.random.uniform(kw1, (D_in, H), minval=-lim1, maxval=lim1, dtype=jnp.float32)
    b1 = jax.random.uniform(kb1, (1, H), minval=-lim1, maxval=lim1, dtype=jnp.float32)
    lim2 = 1.0 / jnp.sqrt(H)
    w2 = jax.random.uniform(kw2, (H, D_out), minval=-lim2, maxval=lim2, dtype=jnp.float32)
    b2 = jax.random.uniform(kb2, (1, D_out), minval=-lim2, maxval=lim2, dtype=jnp.float32)

    y, z = ae2_forward(x, w1, b1, w2, b2)
    jax.block_until_ready((y, z))

    # Correctness check against a pure-JAX reference of the PyTorch forward.
    y_ref, z_ref = ae2_reference(x, w1, b1, w2, b2)
    assert y.shape == (B, D_out) and z.shape == (B, H)
    # Z: exact path (MXU f32 matmul + ReLU).
    assert jnp.allclose(z, z_ref, atol=1e-4, rtol=1e-4), float(jnp.max(jnp.abs(z - z_ref)))
    # Y: approx (~2^-12 rel-err) EUP reciprocal in the stable sigmoid -> looser tolerance.
    assert jnp.allclose(y, y_ref, atol=2e-3, rtol=2e-3), float(jnp.max(jnp.abs(y - y_ref)))
    assert bool(jnp.all(jnp.isfinite(y))) and bool(jnp.all(jnp.isfinite(z)))

    # TODO(synk): AE2.loss (BCE + l1 * mean L1 of Z) and the Adadelta optimizer are
    # training-time utilities, not part of forward(); not implemented here.
    print("KERNEL_OK")
</pallas_src>

<mosaic_0001>
module attributes {stable_mosaic.version = 11 : i64} {
  func.func @ae2_kernel(%arg0: i32, %arg1: memref<200x64xf32, #tpu.memory_space<vmem>>, %arg2: memref<64x32xf32, #tpu.memory_space<vmem>>, %arg3: memref<1x32xf32, #tpu.memory_space<vmem>>, %arg4: memref<32x48xf32, #tpu.memory_space<vmem>>, %arg5: memref<1x48xf32, #tpu.memory_space<vmem>>, %arg6: memref<200x48xf32, #tpu.memory_space<vmem>>, %arg7: memref<200x32xf32, #tpu.memory_space<vmem>>) attributes {dimension_semantics = [#tpu.dimension_semantics<parallel>], iteration_bounds = array<i64: 1>, scalar_prefetch = 0 : i64, scratch_operands = 0 : i64, tpu.core_type = #tpu.core_type<tc>, window_params = [{transform_indices = @transform_0, window_bounds = array<i64: 200, 64>}, {pipeline_mode = #tpu.pipeline_mode<synchronous>, transform_indices = @transform_1, window_bounds = array<i64: 64, 32>}, {pipeline_mode = #tpu.pipeline_mode<synchronous>, transform_indices = @transform_2, window_bounds = array<i64: 1, 32>}, {pipeline_mode = #tpu.pipeline_mode<synchronous>, transform_indices = @transform_3, window_bounds = array<i64: 32, 48>}, {pipeline_mode = #tpu.pipeline_mode<synchronous>, transform_indices = @transform_4, window_bounds = array<i64: 1, 48>}, {transform_indices = @transform_5, window_bounds = array<i64: 200, 48>}, {transform_indices = @transform_6, window_bounds = array<i64: 200, 32>}]} {
    %c0 = arith.constant 0 : index
    %c0_0 = arith.constant 0 : index
    %0 = vector.load %arg1[%c0, %c0_0] : memref<200x64xf32, #tpu.memory_space<vmem>>, vector<200x64xf32>
    %c0_1 = arith.constant 0 : index
    %c0_2 = arith.constant 0 : index
    %1 = vector.load %arg2[%c0_1, %c0_2] : memref<64x32xf32, #tpu.memory_space<vmem>>, vector<64x32xf32>
    %cst = arith.constant dense<0.000000e+00> : vector<200x32xf32>
    %2 = tpu.matmul %0, %1, %cst {dimension_numbers = #tpu.dot_dimension_numbers<[1], [0], [0], [1], [0, 0, 1, 1], [], []>} : vector<200x64xf32>, vector<64x32xf32>, vector<200x32xf32> -> vector<200x32xf32>
    %c0_3 = arith.constant 0 : index
    %c0_4 = arith.constant 0 : index
    %3 = vector.load %arg3[%c0_3, %c0_4] : memref<1x32xf32, #tpu.memory_space<vmem>>, vector<1x32xf32>
    %4 = vector.broadcast %3 : vector<1x32xf32> to vector<200x32xf32>
    %5 = arith.addf %2, %4 : vector<200x32xf32>
    %cst_5 = arith.constant 0.000000e+00 : f32
    %6 = vector.broadcast %cst_5 : f32 to vector<200x32xf32>
    %7 = arith.maximumf %5, %6 : vector<200x32xf32>
    %c0_6 = arith.constant 0 : index
    %c0_7 = arith.constant 0 : index
    %8 = vector.load %arg7[%c0_6, %c0_7] : memref<200x32xf32, #tpu.memory_space<vmem>>, vector<200x32xf32>
    tpu.vector_store %arg7[%c0_6, %c0_7], %7 {strides = array<i32>} : memref<200x32xf32, #tpu.memory_space<vmem>>, vector<200x32xf32>,
    %c0_8 = arith.constant 0 : index
    %c0_9 = arith.constant 0 : index
    %9 = vector.load %arg4[%c0_8, %c0_9] : memref<32x48xf32, #tpu.memory_space<vmem>>, vector<32x48xf32>
    %cst_10 = arith.constant dense<0.000000e+00> : vector<200x48xf32>
    %10 = tpu.matmul %7, %9, %cst_10 {dimension_numbers = #tpu.dot_dimension_numbers<[1], [0], [0], [1], [0, 0, 1, 1], [], []>} : vector<200x32xf32>, vector<32x48xf32>, vector<200x48xf32> -> vector<200x48xf32>
    %c0_11 = arith.constant 0 : index
    %c0_12 = arith.constant 0 : index
    %11 = vector.load %arg5[%c0_11, %c0_12] : memref<1x48xf32, #tpu.memory_space<vmem>>, vector<1x48xf32>
    %12 = vector.broadcast %11 : vector<1x48xf32> to vector<200x48xf32>
    %13 = arith.addf %10, %12 : vector<200x48xf32>
    %14 = math.absf %13 : vector<200x48xf32>
    %cst_13 = arith.constant 0.000000e+00 : f32
    %15 = vector.broadcast %cst_13 : f32 to vector<200x48xf32>
    %16 = arith.subf %15, %14 : vector<200x48xf32>
    %17 = math.exp %16 : vector<200x48xf32>
    %cst_14 = arith.constant 1.000000e+00 : f32
    %18 = vector.broadcast %cst_14 : f32 to vector<200x48xf32>
    %19 = arith.addf %18, %17 : vector<200x48xf32>
    %20 = tpu.reciprocal %19 {approx = true} : vector<200x48xf32> -> vector<200x48xf32>
    %cst_15 = arith.constant 0.000000e+00 : f32
    %21 = vector.broadcast %cst_15 : f32 to vector<200x48xf32>
    %22 = arith.cmpf oge, %13, %21 : vector<200x48xf32>
    %cst_16 = arith.constant 1.000000e+00 : f32
    %23 = vector.broadcast %cst_16 : f32 to vector<200x48xf32>
    %24 = arith.select %22, %23, %17 : vector<200x48xi1>, vector<200x48xf32>
    %25 = arith.mulf %24, %20 : vector<200x48xf32>
    %c0_17 = arith.constant 0 : index
    %c0_18 = arith.constant 0 : index
    %26 = vector.load %arg6[%c0_17, %c0_18] : memref<200x48xf32, #tpu.memory_space<vmem>>, vector<200x48xf32>
    tpu.vector_store %arg6[%c0_17, %c0_18], %25 {strides = array<i32>} : memref<200x48xf32, #tpu.memory_space<vmem>>, vector<200x48xf32>,
    return
  }
  func.func @transform_0(%arg0: i32) -> (i32, i32) {
    %c0_i32 = arith.constant 0 : i32
    %c0_i32_0 = arith.constant 0 : i32
    return %arg0, %c0_i32 : i32, i32
  }
  func.func @transform_1(%arg0: i32) -> (i32, i32) {
    %c0_i32 = arith.constant 0 : i32
    %c0_i32_0 = arith.constant 0 : i32
    %c0_i32_1 = arith.constant 0 : i32
    return %c0_i32, %c0_i32_0 : i32, i32
  }
  func.func @transform_2(%arg0: i32) -> (i32, i32) {
    %c0_i32 = arith.constant 0 : i32
    %c0_i32_0 = arith.constant 0 : i32
    %c0_i32_1 = arith.constant 0 : i32
    return %c0_i32, %c0_i32_0 : i32, i32
  }
  func.func @transform_3(%arg0: i32) -> (i32, i32) {
    %c0_i32 = arith.constant 0 : i32
    %c0_i32_0 = arith.constant 0 : i32
    %c0_i32_1 = arith.constant 0 : i32
    return %c0_i32, %c0_i32_0 : i32, i32
  }
  func.func @transform_4(%arg0: i32) -> (i32, i32) {
    %c0_i32 = arith.constant 0 : i32
    %c0_i32_0 = arith.constant 0 : i32
    %c0_i32_1 = arith.constant 0 : i32
    return %c0_i32, %c0_i32_0 : i32, i32
  }
  func.func @transform_5(%arg0: i32) -> (i32, i32) {
    %c0_i32 = arith.constant 0 : i32
    %c0_i32_0 = arith.constant 0 : i32
    return %arg0, %c0_i32 : i32, i32
  }
  func.func @transform_6(%arg0: i32) -> (i32, i32) {
    %c0_i32 = arith.constant 0 : i32
    %c0_i32_0 = arith.constant 0 : i32
    return %arg0, %c0_i32 : i32, i32
  }
}

module attributes {stable_mosaic.version = 11 : i64} {
  func.func @ae2_kernel(%arg0: i32, %arg1: memref<200x64xf32, #tpu.memory_space<vmem>>, %arg2: memref<64x32xf32, #tpu.memory_space<vmem>>, %arg3: memref<1x32xf32, #tpu.memory_space<vmem>>, %arg4: memref<32x48xf32, #tpu.memory_space<vmem>>, %arg5: memref<1x48xf32, #tpu.memory_space<vmem>>, %arg6: memref<200x48xf32, #tpu.memory_space<vmem>>, %arg7: memref<200x32xf32, #tpu.memory_space<vmem>>) attributes {dimension_semantics = [#tpu.dimension_semantics<parallel>], iteration_bounds = array<i64: 1>, scalar_prefetch = 0 : i64, scratch_operands = 0 : i64, tpu.core_type = #tpu.core_type<tc>, window_params = [{transform_indices = @transform_0, window_bounds = array<i64: 200, 64>}, {pipeline_mode = #tpu.pipeline_mode<synchronous>, transform_indices = @transform_1, window_bounds = array<i64: 64, 32>}, {pipeline_mode = #tpu.pipeline_mode<synchronous>, transform_indices = @transform_2, window_bounds = array<i64: 1, 32>}, {pipeline_mode = #tpu.pipeline_mode<synchronous>, transform_indices = @transform_3, window_bounds = array<i64: 32, 48>}, {pipeline_mode = #tpu.pipeline_mode<synchronous>, transform_indices = @transform_4, window_bounds = array<i64: 1, 48>}, {transform_indices = @transform_5, window_bounds = array<i64: 200, 48>}, {transform_indices = @transform_6, window_bounds = array<i64: 200, 32>}]} {
    %c0 = arith.constant 0 : index
    %c0_0 = arith.constant 0 : index
    %0 = vector.load %arg1[%c0, %c0_0] : memref<200x64xf32, #tpu.memory_space<vmem>>, vector<200x64xf32>
    %c0_1 = arith.constant 0 : index
    %c0_2 = arith.constant 0 : index
    %1 = vector.load %arg2[%c0_1, %c0_2] : memref<64x32xf32, #tpu.memory_space<vmem>>, vector<64x32xf32>
    %cst = arith.constant dense<0.000000e+00> : vector<200x32xf32>
    %2 = tpu.matmul %0, %1, %cst {dimension_numbers = #tpu.dot_dimension_numbers<[1], [0], [0], [1], [0, 0, 1, 1], [], []>} : vector<200x64xf32>, vector<64x32xf32>, vector<200x32xf32> -> vector<200x32xf32>
    %c0_3 = arith.constant 0 : index
    %c0_4 = arith.constant 0 : index
    %3 = vector.load %arg3[%c0_3, %c0_4] : memref<1x32xf32, #tpu.memory_space<vmem>>, vector<1x32xf32>
    %4 = vector.broadcast %3 : vector<1x32xf32> to vector<200x32xf32>
    %5 = arith.addf %2, %4 : vector<200x32xf32>
    %cst_5 = arith.constant 0.000000e+00 : f32
    %6 = vector.broadcast %cst_5 : f32 to vector<200x32xf32>
    %7 = arith.maximumf %5, %6 : vector<200x32xf32>
    %c0_6 = arith.constant 0 : index
    %c0_7 = arith.constant 0 : index
    %8 = vector.load %arg7[%c0_6, %c0_7] : memref<200x32xf32, #tpu.memory_space<vmem>>, vector<200x32xf32>
    tpu.vector_store %arg7[%c0_6, %c0_7], %7 {strides = array<i32>} : memref<200x32xf32, #tpu.memory_space<vmem>>, vector<200x32xf32>,
    %c0_8 = arith.constant 0 : index
    %c0_9 = arith.constant 0 : index
    %9 = vector.load %arg4[%c0_8, %c0_9] : memref<32x48xf32, #tpu.memory_space<vmem>>, vector<32x48xf32>
    %cst_10 = arith.constant dense<0.000000e+00> : vector<200x48xf32>
    %10 = tpu.matmul %7, %9, %cst_10 {dimension_numbers = #tpu.dot_dimension_numbers<[1], [0], [0], [1], [0, 0, 1, 1], [], []>} : vector<200x32xf32>, vector<32x48xf32>, vector<200x48xf32> -> vector<200x48xf32>
    %c0_11 = arith.constant 0 : index
    %c0_12 = arith.constant 0 : index
    %11 = vector.load %arg5[%c0_11, %c0_12] : memref<1x48xf32, #tpu.memory_space<vmem>>, vector<1x48xf32>
    %12 = vector.broadcast %11 : vector<1x48xf32> to vector<200x48xf32>
    %13 = arith.addf %10, %12 : vector<200x48xf32>
    %14 = math.absf %13 : vector<200x48xf32>
    %cst_13 = arith.constant 0.000000e+00 : f32
    %15 = vector.broadcast %cst_13 : f32 to vector<200x48xf32>
    %16 = arith.subf %15, %14 : vector<200x48xf32>
    %17 = math.exp %16 : vector<200x48xf32>
    %cst_14 = arith.constant 1.000000e+00 : f32
    %18 = vector.broadcast %cst_14 : f32 to vector<200x48xf32>
    %19 = arith.addf %18, %17 : vector<200x48xf32>
    %20 = tpu.reciprocal %19 {approx = true} : vector<200x48xf32> -> vector<200x48xf32>
    %cst_15 = arith.constant 0.000000e+00 : f32
    %21 = vector.broadcast %cst_15 : f32 to vector<200x48xf32>
    %22 = arith.cmpf oge, %13, %21 : vector<200x48xf32>
    %cst_16 = arith.constant 1.000000e+00 : f32
    %23 = vector.broadcast %cst_16 : f32 to vector<200x48xf32>
    %24 = arith.select %22, %23, %17 : vector<200x48xi1>, vector<200x48xf32>
    %25 = arith.mulf %24, %20 : vector<200x48xf32>
    %c0_17 = arith.constant 0 : index
    %c0_18 = arith.constant 0 : index
    %26 = vector.load %arg6[%c0_17, %c0_18] : memref<200x48xf32, #tpu.memory_space<vmem>>, vector<200x48xf32>
    tpu.vector_store %arg6[%c0_17, %c0_18], %25 {strides = array<i32>} : memref<200x48xf32, #tpu.memory_space<vmem>>, vector<200x48xf32>,
    return
  }
  func.func @transform_0(%arg0: i32) -> (i32, i32) {
    %c0_i32 = arith.constant 0 : i32
    %c0_i32_0 = arith.constant 0 : i32
    return %arg0, %c0_i32 : i32, i32
  }
  func.func @transform_1(%arg0: i32) -> (i32, i32) {
    %c0_i32 = arith.constant 0 : i32
    %c0_i32_0 = arith.constant 0 : i32
    %c0_i32_1 = arith.constant 0 : i32
    return %c0_i32, %c0_i32_0 : i32, i32
  }
  func.func @transform_2(%arg0: i32) -> (i32, i32) {
    %c0_i32 = arith.constant 0 : i32
    %c0_i32_0 = arith.constant 0 : i32
    %c0_i32_1 = arith.constant 0 : i32
    return %c0_i32, %c0_i32_0 : i32, i32
  }
  func.func @transform_3(%arg0: i32) -> (i32, i32) {
    %c0_i32 = arith.constant 0 : i32
    %c0_i32_0 = arith.constant 0 : i32
    %c0_i32_1 = arith.constant 0 : i32
    return %c0_i32, %c0_i32_0 : i32, i32
  }
  func.func @transform_4(%arg0: i32) -> (i32, i32) {
    %c0_i32 = arith.constant 0 : i32
    %c0_i32_0 = arith.constant 0 : i32
    %c0_i32_1 = arith.constant 0 : i32
    return %c0_i32, %c0_i32_0 : i32, i32
  }
  func.func @transform_5(%arg0: i32) -> (i32, i32) {
    %c0_i32 = arith.constant 0 : i32
    %c0_i32_0 = arith.constant 0 : i32
    return %arg0, %c0_i32 : i32, i32
  }
  func.func @transform_6(%arg0: i32) -> (i32, i32) {
    %c0_i32 = arith.constant 0 : i32
    %c0_i32_0 = arith.constant 0 : i32
    return %arg0, %c0_i32 : i32, i32
  }
}

</mosaic_0001>

<bundles_post_ra>
// kernel: tpu_custom_call.1
= control target key start
LH: loop header
LB: loop body
LE: loop exit
PB: predicated region body
PF: predicated region fallthrough
CT: control target
= control target key end

     0   :  { %v1323_v0 = vmov 0.0|0.0   ;;  %vm1324_vm0 = vmmov 0   ;;  %v1325_v4 = vmov 0.0   ;;  %vm62_vm1 = vcmask 523264   ;;  %s1982_s1 = inlined_call_operand.vmem [shape: f32[64,32], index: 1, kind: input, shape index: {}]   ;;  %s1983_s3 = inlined_call_operand.vmem [shape: f32[32,48], index: 3, kind: input, shape index: {}]   ;;  %s1984_s0 = inlined_call_operand.vmem [shape: f32[200,64], index: 0, kind: input, shape index: {}]   ;;  %s1985_s2 = inlined_call_operand.vmem [shape: f32[1,32], index: 2, kind: input, shape index: {}]   ;;  %s1986_s6 = inlined_call_operand.vmem [shape: f32[200,32], index: 6, kind: output, shape index: {1}]   ;;  %s1987_s4 = inlined_call_operand.vmem [shape: f32[1,48], index: 4, kind: input, shape index: {}]   ;;  %s1988_s5 = inlined_call_operand.vmem [shape: f32[200,48], index: 5, kind: output, shape index: {0}]  }
   0x1   :  { %1202 = vmatprep.subr.bf16.mxu0 %v1323_v0  ;;  %v47_v1 = vld [vmem:[%s1982_s1] sm:$0xff]  ;;  %v48_v2 = vld [vmem:[%s1982_s1 + $0x8] sm:$0xff]  ;;  %v49_v3 = vld [vmem:[%s1982_s1 + $0x10] sm:$0xff]  ;;  %1044 = vmatprep.mubr.msk.f32.mxu0 %vm1324_vm0, %v1325_v4  ;;  %vm353_vm2 = vcmask 261120   ;;  %vm880_vm4 = vcmask 392192  }
   0x2   :  { %v1203_v5 = vpack.c.bf16 %v48_v2, %v47_v1  ;;  %v50_v6 = vld [vmem:[%s1982_s1 + $0x18] sm:$0xff]  ;;  %1214 = vmatprep.subr.bf16.mxu1 %v1323_v0  ;;  %1127 = vmatprep.mubr.msk.f32.mxu1 %vm1324_vm0, %v1325_v4  ;;  %v51_v8 = vld [vmem:[%s1982_s1 + $0x20] sm:$0xff]  ;;  %v52_v9 = vld [vmem:[%s1982_s1 + $0x28] sm:$0xff] }
   0x3   :  { %v1206_v7 = vpack.c.bf16 %v50_v6, %v49_v3  ;;  %v1209_v10 = vpack.c.bf16 %v52_v9, %v51_v8  ;;  %v53_v11 = vld [vmem:[%s1982_s1 + $0x30] sm:$0xff]  ;;  %v54_v12 = vld [vmem:[%s1982_s1 + $0x38] sm:$0xff]  ;;  %v379_v14 = vld [vmem:[%s1983_s3] sm:$0xff] }
   0x4   :  { %1204 = vmatpush3.bf16.msra.mxu0 %v1203_v5  ;;  %v1212_v13 = vpack.c.bf16 %v54_v12, %v53_v11  ;;  %v380_v15 = vld [vmem:[%s1983_s3 + $0x8] sm:$0xff]  ;;  %v22_v17 = vld [vmem:[%s1984_s0] sm:$0xff]  ;;  %v24_v19 = vld [vmem:[%s1984_s0 + $0x10] sm:$0xff] }
   0x5   :  { %1205 = vmatprep.subr.bf16.mxu0 %v1323_v0  ;;  %v1215_v16 = vpack.c.bf16 %v380_v15, %v379_v14  ;;  %v23_v18 = vld [vmem:[%s1984_s0 + $0x8] sm:$0xff]  ;;  %v25_v20 = vld [vmem:[%s1984_s0 + $0x18] sm:$0xff]  ;;  %v26_v21 = vld [vmem:[%s1984_s0 + $0x20] sm:$0xff] }
   0x6   :  { %v27_v22 = vld [vmem:[%s1984_s0 + $0x28] sm:$0xff]  ;;  %v28_v23 = vld [vmem:[%s1984_s0 + $0x30] sm:$0xff]  ;;  %v29_v24 = vld [vmem:[%s1984_s0 + $0x38] sm:$0xff] }
   0x7   :  { %1216 = vmatpush3.bf16.msra.mxu1 %v1215_v16  ;;  %v30_v25 = vld [vmem:[%s1984_s0 + $0x40] sm:$0xff]  ;;  %v31_v26 = vld [vmem:[%s1984_s0 + $0x48] sm:$0xff]  ;;  %v32_v27 = vld [vmem:[%s1984_s0 + $0x50] sm:$0xff] }
   0x8   :  { %1207 = vmatpush3.bf16.msra.mxu0 %v1206_v7  ;;  %1217 = vmatprep.subr.bf16.mxu1 %v1323_v0  ;;  %v33_v28 = vld [vmem:[%s1984_s0 + $0x58] sm:$0xff]  ;;  %v34_v29 = vld [vmem:[%s1984_s0 + $0x60] sm:$0xff]  ;;  %v35_v30 = vld [vmem:[%s1984_s0 + $0x68] sm:$0xff] }
   0x9   :  { %1208 = vmatprep.subr.bf16.mxu0 %v1323_v0  ;;  %v36_v31 = vld [vmem:[%s1984_s0 + $0x70] sm:$0xff]  ;;  %v37_v32 = vld [vmem:[%s1984_s0 + $0x78] sm:$0xff]  ;;  %v38_v33 = vld [vmem:[%s1984_s0 + $0x80] sm:$0xff] }
   0xa   :  { %v39_v34 = vld [vmem:[%s1984_s0 + $0x88] sm:$0xff]  ;;  %v40_v35 = vld [vmem:[%s1984_s0 + $0x90] sm:$0xff]  ;;  %v41_v36 = vld [vmem:[%s1984_s0 + $0x98] sm:$0xff] }
   0xb   :  { %v42_v37 = vld [vmem:[%s1984_s0 + $0xa0] sm:$0xff]  ;;  %v43_v38 = vld [vmem:[%s1984_s0 + $0xa8] sm:$0xff]  ;;  %v381_v39 = vld [vmem:[%s1983_s3 + $0x10] sm:$0xff] }
   0xc   :  { %1210 = vmatpush3.bf16.msra.mxu0 %v1209_v10  ;;  %v382_v40 = vld [vmem:[%s1983_s3 + $0x18] sm:$0xff]  ;;  %v44_v42 = vld [vmem:[%s1984_s0 + $0xb0] sm:$0xff]  ;;  %v46_v44 = vld [vmem:[%s1984_s0 + $0xc0] sm:$0xff] }
   0xd   :  { %1211 = vmatprep.subr.bf16.mxu0 %v1323_v0  ;;  %v1218_v41 = vpack.c.bf16 %v382_v40, %v381_v39  ;;  %v45_v43 = vld [vmem:[%s1984_s0 + $0xb8] sm:$0xff]  ;;  %v1552_v45 = vld [vmem:[%s1985_s2] ss:$0 sm:$0xff] }
   0xf   :  { %1219 = vmatpush3.bf16.msra.mxu1 %v1218_v41 }
  0x10   :  { %1213 = vmatpush3.bf16.msra.mxu0 %v1212_v13 }
  0x13   :  { %1045 = vmatmul.mubr.msk.f32.vlgmr.msra.gmra.mrb[0].mxu0 %vm62_vm1, %v22_v17 }
  0x14   :  { %1047 = vmatprep.mubr.msk.f32.mxu0 %vm1324_vm0, %v1325_v4 }
  0x17   :  { %1048 = vmatmul.mubr.msk.f32.gmra.mrb[2].mxu0 %vm62_vm1, %v23_v18 }
  0x18   :  { %1050 = vmatprep.mubr.msk.f32.mxu0 %vm1324_vm0, %v1325_v4 }
  0x1b   :  { %1051 = vmatmul.mubr.msk.f32.gmra.mrb[4].mxu0 %vm62_vm1, %v24_v19 }
  0x1c   :  { %1053 = vmatprep.mubr.msk.f32.mxu0 %vm1324_vm0, %v1325_v4 }
  0x1f   :  { %1054 = vmatmul.mubr.msk.f32.gmra.mrb[6].mxu0 %vm62_vm1, %v25_v20 }
  0x20   :  { %1056 = vmatprep.mubr.msk.f32.mxu0 %vm1324_vm0, %v1325_v4 }
  0x23   :  { %1057 = vmatmul.mubr.msk.f32.gmra.mrb[8].mxu0 %vm62_vm1, %v26_v21 }
  0x24   :  { %1059 = vmatprep.mubr.msk.f32.mxu0 %vm1324_vm0, %v1325_v4 }
  0x27   :  { %1060 = vmatmul.mubr.msk.f32.gmra.mrb[10].mxu0 %vm62_vm1, %v27_v22 }
  0x28   :  { %1062 = vmatprep.mubr.msk.f32.mxu0 %vm1324_vm0, %v1325_v4 }
  0x2b   :  { %1063 = vmatmul.mubr.msk.f32.gmra.mrb[12].mxu0 %vm62_vm1, %v28_v23 }
  0x2c   :  { %1065 = vmatprep.mubr.msk.f32.mxu0 %vm1324_vm0, %v1325_v4 }
  0x2f   :  { %1066 = vmatmul.mubr.msk.f32.gmra.mrb[14].mxu0 %vm62_vm1, %v29_v24 }
  0x30   :  { %1068 = vmatprep.mubr.msk.f32.mxu0 %vm1324_vm0, %v1325_v4 }
  0x33   :  { %1069 = vmatmul.mubr.msk.f32.gmra.mrb[16].mxu0 %vm62_vm1, %v30_v25 }
  0x34   :  { %1071 = vmatprep.mubr.msk.f32.mxu0 %vm1324_vm0, %v1325_v4 }
  0x37   :  { %1072 = vmatmul.mubr.msk.f32.gmra.mrb[18].mxu0 %vm62_vm1, %v31_v26 }
  0x38   :  { %1074 = vmatprep.mubr.msk.f32.mxu0 %vm1324_vm0, %v1325_v4 }
  0x3b   :  { %1075 = vmatmul.mubr.msk.f32.gmra.mrb[20].mxu0 %vm62_vm1, %v32_v27 }
  0x3c   :  { %1077 = vmatprep.mubr.msk.f32.mxu0 %vm1324_vm0, %v1325_v4 }
  0x3f   :  { %1078 = vmatmul.mubr.msk.f32.gmra.mrb[22].mxu0 %vm62_vm1, %v33_v28 }
  0x40   :  { %1080 = vmatprep.mubr.msk.f32.mxu0 %vm1324_vm0, %v1325_v4 }
  0x43   :  { %1081 = vmatmul.mubr.msk.f32.gmra.mrb[24].mxu0 %vm62_vm1, %v34_v29 }
  0x44   :  { %1083 = vmatprep.mubr.msk.f32.mxu0 %vm1324_vm0, %v1325_v4 }
  0x47   :  { %1084 = vmatmul.mubr.msk.f32.gmra.mrb[26].mxu0 %vm62_vm1, %v35_v30 }
  0x48   :  { %1086 = vmatprep.mubr.msk.f32.mxu0 %vm1324_vm0, %v1325_v4 }
  0x4b   :  { %1087 = vmatmul.mubr.msk.f32.gmra.mrb[28].mxu0 %vm62_vm1, %v36_v31 }
  0x4c   :  { %1089 = vmatprep.mubr.msk.f32.mxu0 %vm1324_vm0, %v1325_v4 }
  0x4f   :  { %1090 = vmatmul.mubr.msk.f32.gmra.mrb[30].mxu0 %vm62_vm1, %v37_v32 }
  0x50   :  { %1092 = vmatprep.mubr.msk.f32.mxu0 %vm1324_vm0, %v1325_v4 }
  0x53   :  { %1093 = vmatmul.mubr.msk.f32.gmra.mrb[32].mxu0 %vm62_vm1, %v38_v33 }
  0x54   :  { %1095 = vmatprep.mubr.msk.f32.mxu0 %vm1324_vm0, %v1325_v4 }
  0x57   :  { %1096 = vmatmul.mubr.msk.f32.gmra.mrb[34].mxu0 %vm62_vm1, %v39_v34 }
  0x58   :  { %1098 = vmatprep.mubr.msk.f32.mxu0 %vm1324_vm0, %v1325_v4 }
  0x5b   :  { %1099 = vmatmul.mubr.msk.f32.gmra.mrb[36].mxu0 %vm62_vm1, %v40_v35 }
  0x5c   :  { %1101 = vmatprep.mubr.msk.f32.mxu0 %vm1324_vm0, %v1325_v4 }
  0x5f   :  { %1102 = vmatmul.mubr.msk.f32.gmra.mrb[38].mxu0 %vm62_vm1, %v41_v36 }
  0x60   :  { %1104 = vmatprep.mubr.msk.f32.mxu0 %vm1324_vm0, %v1325_v4 }
  0x63   :  { %1105 = vmatmul.mubr.msk.f32.gmra.mrb[40].mxu0 %vm62_vm1, %v42_v37 }
  0x64   :  { %1107 = vmatprep.mubr.msk.f32.mxu0 %vm1324_vm0, %v1325_v4 }
  0x67   :  { %1108 = vmatmul.mubr.msk.f32.gmra.mrb[42].mxu0 %vm62_vm1, %v43_v38 }
  0x68   :  { %1110 = vmatprep.mubr.msk.f32.mxu0 %vm1324_vm0, %v1325_v4 }
  0x6b   :  { %1111 = vmatmul.mubr.msk.f32.gmra.mrb[44].mxu0 %vm62_vm1, %v44_v42 }
  0x6c   :  { %1113 = vmatprep.mubr.msk.f32.mxu0 %vm1324_vm0, %v1325_v4 }
  0x6f   :  { %1114 = vmatmul.mubr.msk.f32.gmra.mrb[46].mxu0 %vm62_vm1, %v45_v43 }
  0x70   :  { %1116 = vmatprep.mubr.msk.f32.mxu0 %vm1324_vm0, %v1325_v4 }
  0x73   :  { %1117 = vmatmul.mubr.msk.f32.gmra.mrb[48].mxu0 %vm62_vm1, %v46_v44 }
  0xe6   :  { %v204_v46 = vpop.f32.mrb[0].mxu0 }
  0xe7   :  { %v205_v47 = vadd.f32 %v1552_v45, %v204_v46  ;;  %v1046_v48 = vpop.f32.mrb[1].mxu0 }
  0xe9   :  { %v328_v49 = vmax.f32 %v205_v47, 0.0 }
  0xea   :  { %v209_v50 = vpop.f32.mrb[2].mxu0 }
  0xeb   :  { %354 = vst.msk [vmem:[%s1986_s6] sm:$0xff] %vm353_vm2, %v328_v49  ;;  %v210_v51 = vadd.f32 %v1552_v45, %v209_v50  ;;  %v1049_v52 = vpop.f32.mrb[3].mxu0  ;;  %1128 = vmatmul.mubr.msk.f32.vlgmr.msra.gmra.mrb[0].mxu1 %vm353_vm2, %v328_v49 }
  0xec   :  { %1130 = vmatprep.mubr.msk.f32.mxu1 %vm1324_vm0, %v1325_v4 }
  0xed   :  { %v329_v53 = vmax.f32 %v210_v51, 0.0 }
  0xee   :  { %v214_v54 = vpop.f32.mrb[4].mxu0 }
  0xef   :  { %355 = vst.msk [vmem:[%s1986_s6 + $0x8] sm:$0xff] %vm353_vm2, %v329_v53  ;;  %v215_v55 = vadd.f32 %v1552_v45, %v214_v54  ;;  %v1052_v56 = vpop.f32.mrb[5].mxu0  ;;  %1131 = vmatmul.mubr.msk.f32.gmra.mrb[2].mxu1 %vm353_vm2, %v329_v53 }
  0xf0   :  { %1133 = vmatprep.mubr.msk.f32.mxu1 %vm1324_vm0, %v1325_v4 }
  0xf1   :  { %v330_v57 = vmax.f32 %v215_v55, 0.0 }
  0xf2   :  { %v219_v58 = vpop.f32.mrb[6].mxu0 }
  0xf3   :  { %356 = vst.msk [vmem:[%s1986_s6 + $0x10] sm:$0xff] %vm353_vm2, %v330_v57  ;;  %v220_v59 = vadd.f32 %v1552_v45, %v219_v58  ;;  %v1055_v60 = vpop.f32.mrb[7].mxu0  ;;  %1134 = vmatmul.mubr.msk.f32.gmra.mrb[4].mxu1 %vm353_vm2, %v330_v57 }
  0xf4   :  { %1136 = vmatprep.mubr.msk.f32.mxu1 %vm1324_vm0, %v1325_v4 }
  0xf5   :  { %v331_v61 = vmax.f32 %v220_v59, 0.0 }
  0xf6   :  { %v224_v62 = vpop.f32.mrb[8].mxu0 }
  0xf7   :  { %357 = vst.msk [vmem:[%s1986_s6 + $0x18] sm:$0xff] %vm353_vm2, %v331_v61  ;;  %v225_v63 = vadd.f32 %v1552_v45, %v224_v62  ;;  %v1058_v0 = vpop.f32.mrb[9].mxu0  ;;  %1137 = vmatmul.mubr.msk.f32.gmra.mrb[6].mxu1 %vm353_vm2, %v331_v61 }
  0xf8   :  { %1139 = vmatprep.mubr.msk.f32.mxu1 %vm1324_vm0, %v1325_v4 }
  0xf9   :  { %v332_v1 = vmax.f32 %v225_v63, 0.0 }
  0xfa   :  { %v229_v2 = vpop.f32.mrb[10].mxu0 }
  0xfb   :  { %358 = vst.msk [vmem:[%s1986_s6 + $0x20] sm:$0xff] %vm353_vm2, %v332_v1  ;;  %v230_v3 = vadd.f32 %v1552_v45, %v229_v2  ;;  %v1061_v5 = vpop.f32.mrb[11].mxu0  ;;  %1140 = vmatmul.mubr.msk.f32.gmra.mrb[8].mxu1 %vm353_vm2, %v332_v1 }
  0xfc   :  { %1142 = vmatprep.mubr.msk.f32.mxu1 %vm1324_vm0, %v1325_v4 }
  0xfd   :  { %v333_v6 = vmax.f32 %v230_v3, 0.0 }
  0xfe   :  { %v234_v7 = vpop.f32.mrb[12].mxu0 }
  0xff   :  { %359 = vst.msk [vmem:[%s1986_s6 + $0x28] sm:$0xff] %vm353_vm2, %v333_v6  ;;  %v235_v8 = vadd.f32 %v1552_v45, %v234_v7  ;;  %v1064_v9 = vpop.f32.mrb[13].mxu0  ;;  %1143 = vmatmul.mubr.msk.f32.gmra.mrb[10].mxu1 %vm353_vm2, %v333_v6 }
 0x100   :  { %1145 = vmatprep.mubr.msk.f32.mxu1 %vm1324_vm0, %v1325_v4 }
 0x101   :  { %v334_v10 = vmax.f32 %v235_v8, 0.0 }
 0x102   :  { %v239_v11 = vpop.f32.mrb[14].mxu0 }
 0x103   :  { %360 = vst.msk [vmem:[%s1986_s6 + $0x30] sm:$0xff] %vm353_vm2, %v334_v10  ;;  %v240_v12 = vadd.f32 %v1552_v45, %v239_v11  ;;  %v1067_v13 = vpop.f32.mrb[15].mxu0  ;;  %1146 = vmatmul.mubr.msk.f32.gmra.mrb[12].mxu1 %vm353_vm2, %v334_v10 }
 0x104   :  { %1148 = vmatprep.mubr.msk.f32.mxu1 %vm1324_vm0, %v1325_v4 }
 0x105   :  { %v335_v14 = vmax.f32 %v240_v12, 0.0 }
 0x106   :  { %v244_v15 = vpop.f32.mrb[16].mxu0 }
 0x107   :  { %361 = vst.msk [vmem:[%s1986_s6 + $0x38] sm:$0xff] %vm353_vm2, %v335_v14  ;;  %v245_v16 = vadd.f32 %v1552_v45, %v244_v15  ;;  %v1070_v17 = vpop.f32.mrb[17].mxu0  ;;  %1149 = vmatmul.mubr.msk.f32.gmra.mrb[14].mxu1 %vm353_vm2, %v335_v14 }
 0x108   :  { %1151 = vmatprep.mubr.msk.f32.mxu1 %vm1324_vm0, %v1325_v4 }
 0x109   :  { %v336_v18 = vmax.f32 %v245_v16, 0.0 }
 0x10a   :  { %v249_v19 = vpop.f32.mrb[18].mxu0 }
 0x10b   :  { %362 = vst.msk [vmem:[%s1986_s6 + $0x40] sm:$0xff] %vm353_vm2, %v336_v18  ;;  %v250_v20 = vadd.f32 %v1552_v45, %v249_v19  ;;  %v1073_v21 = vpop.f32.mrb[19].mxu0  ;;  %1152 = vmatmul.mubr.msk.f32.gmra.mrb[16].mxu1 %vm353_vm2, %v336_v18 }
 0x10c   :  { %1154 = vmatprep.mubr.msk.f32.mxu1 %vm1324_vm0, %v1325_v4  ;;  %v1755_v21 = vld [vmem:[%s1987_s4] ss:$0 sm:$0xff] }
 0x10d   :  { %v337_v22 = vmax.f32 %v250_v20, 0.0 }
 0x10e   :  { %v254_v23 = vpop.f32.mrb[20].mxu0 }
 0x10f   :  { %363 = vst.msk [vmem:[%s1986_s6 + $0x48] sm:$0xff] %vm353_vm2, %v337_v22  ;;  %v255_v24 = vadd.f32 %v1552_v45, %v254_v23  ;;  %v1076_v25 = vpop.f32.mrb[21].mxu0  ;;  %1155 = vmatmul.mubr.msk.f32.gmra.mrb[18].mxu1 %vm353_vm2, %v337_v22 }
 0x110   :  { %1157 = vmatprep.mubr.msk.f32.mxu1 %vm1324_vm0, %v1325_v4 }
 0x111   :  { %v338_v26 = vmax.f32 %v255_v24, 0.0 }
 0x112   :  { %v259_v27 = vpop.f32.mrb[22].mxu0 }
 0x113   :  { %364 = vst.msk [vmem:[%s1986_s6 + $0x50] sm:$0xff] %vm353_vm2, %v338_v26  ;;  %v260_v28 = vadd.f32 %v1552_v45, %v259_v27  ;;  %v1079_v29 = vpop.f32.mrb[23].mxu0  ;;  %1158 = vmatmul.mubr.msk.f32.gmra.mrb[20].mxu1 %vm353_vm2, %v338_v26 }
 0x114   :  { %1160 = vmatprep.mubr.msk.f32.mxu1 %vm1324_vm0, %v1325_v4 }
 0x115   :  { %v339_v30 = vmax.f32 %v260_v28, 0.0 }
 0x116   :  { %v264_v31 = vpop.f32.mrb[24].mxu0 }
 0x117   :  { %365 = vst.msk [vmem:[%s1986_s6 + $0x58] sm:$0xff] %vm353_vm2, %v339_v30  ;;  %v265_v32 = vadd.f32 %v1552_v45, %v264_v31  ;;  %v1082_v33 = vpop.f32.mrb[25].mxu0  ;;  %1161 = vmatmul.mubr.msk.f32.gmra.mrb[22].mxu1 %vm353_vm2, %v339_v30 }
 0x118   :  { %1163 = vmatprep.mubr.msk.f32.mxu1 %vm1324_vm0, %v1325_v4 }
 0x119   :  { %v340_v34 = vmax.f32 %v265_v32, 0.0 }
 0x11a   :  { %v269_v35 = vpop.f32.mrb[26].mxu0 }
 0x11b   :  { %366 = vst.msk [vmem:[%s1986_s6 + $0x60] sm:$0xff] %vm353_vm2, %v340_v34  ;;  %v270_v36 = vadd.f32 %v1552_v45, %v269_v35  ;;  %v1085_v37 = vpop.f32.mrb[27].mxu0  ;;  %1164 = vmatmul.mubr.msk.f32.gmra.mrb[24].mxu1 %vm353_vm2, %v340_v34 }
 0x11c   :  { %1166 = vmatprep.mubr.msk.f32.mxu1 %vm1324_vm0, %v1325_v4 }
 0x11d   :  { %v341_v38 = vmax.f32 %v270_v36, 0.0 }
 0x11e   :  { %v274_v39 = vpop.f32.mrb[28].mxu0 }
 0x11f   :  { %367 = vst.msk [vmem:[%s1986_s6 + $0x68] sm:$0xff] %vm353_vm2, %v341_v38  ;;  %v275_v40 = vadd.f32 %v1552_v45, %v274_v39  ;;  %v1088_v41 = vpop.f32.mrb[29].mxu0  ;;  %1167 = vmatmul.mubr.msk.f32.gmra.mrb[26].mxu1 %vm353_vm2, %v341_v38 }
 0x120   :  { %1169 = vmatprep.mubr.msk.f32.mxu1 %vm1324_vm0, %v1325_v4 }
 0x121   :  { %v342_v42 = vmax.f32 %v275_v40, 0.0 }
 0x122   :  { %v279_v43 = vpop.f32.mrb[30].mxu0 }
 0x123   :  { %368 = vst.msk [vmem:[%s1986_s6 + $0x70] sm:$0xff] %vm353_vm2, %v342_v42  ;;  %v280_v44 = vadd.f32 %v1552_v45, %v279_v43  ;;  %v1091_v46 = vpop.f32.mrb[31].mxu0  ;;  %1170 = vmatmul.mubr.msk.f32.gmra.mrb[28].mxu1 %vm353_vm2, %v342_v42 }
 0x124   :  { %1172 = vmatprep.mubr.msk.f32.mxu1 %vm1324_vm0, %v1325_v4 }
 0x125   :  { %v343_v47 = vmax.f32 %v280_v44, 0.0 }
 0x126   :  { %v284_v48 = vpop.f32.mrb[32].mxu0 }
 0x127   :  { %369 = vst.msk [vmem:[%s1986_s6 + $0x78] sm:$0xff] %vm353_vm2, %v343_v47  ;;  %v285_v49 = vadd.f32 %v1552_v45, %v284_v48  ;;  %v1094_v50 = vpop.f32.mrb[33].mxu0  ;;  %1173 = vmatmul.mubr.msk.f32.gmra.mrb[30].mxu1 %vm353_vm2, %v343_v47 }
 0x128   :  { %1175 = vmatprep.mubr.msk.f32.mxu1 %vm1324_vm0, %v1325_v4 }
 0x129   :  { %v344_v51 = vmax.f32 %v285_v49, 0.0 }
 0x12a   :  { %v289_v52 = vpop.f32.mrb[34].mxu0 }
 0x12b   :  { %370 = vst.msk [vmem:[%s1986_s6 + $0x80] sm:$0xff] %vm353_vm2, %v344_v51  ;;  %v290_v53 = vadd.f32 %v1552_v45, %v289_v52  ;;  %v1097_v54 = vpop.f32.mrb[35].mxu0  ;;  %1176 = vmatmul.mubr.msk.f32.gmra.mrb[32].mxu1 %vm353_vm2, %v344_v51 }
 0x12c   :  { %1178 = vmatprep.mubr.msk.f32.mxu1 %vm1324_vm0, %v1325_v4 }
 0x12d   :  { %v345_v55 = vmax.f32 %v290_v53, 0.0 }
 0x12e   :  { %v294_v56 = vpop.f32.mrb[36].mxu0 }
 0x12f   :  { %371 = vst.msk [vmem:[%s1986_s6 + $0x88] sm:$0xff] %vm353_vm2, %v345_v55  ;;  %v295_v57 = vadd.f32 %v1552_v45, %v294_v56  ;;  %v1100_v58 = vpop.f32.mrb[37].mxu0  ;;  %1179 = vmatmul.mubr.msk.f32.gmra.mrb[34].mxu1 %vm353_vm2, %v345_v55 }
 0x130   :  { %1181 = vmatprep.mubr.msk.f32.mxu1 %vm1324_vm0, %v1325_v4 }
 0x131   :  { %v346_v59 = vmax.f32 %v295_v57, 0.0 }
 0x132   :  { %v299_v60 = vpop.f32.mrb[38].mxu0 }
 0x133   :  { %372 = vst.msk [vmem:[%s1986_s6 + $0x90] sm:$0xff] %vm353_vm2, %v346_v59  ;;  %v300_v61 = vadd.f32 %v1552_v45, %v299_v60  ;;  %v1103_v62 = vpop.f32.mrb[39].mxu0  ;;  %1182 = vmatmul.mubr.msk.f32.gmra.mrb[36].mxu1 %vm353_vm2, %v346_v59 }
 0x134   :  { %1184 = vmatprep.mubr.msk.f32.mxu1 %vm1324_vm0, %v1325_v4 }
 0x135   :  { %v347_v63 = vmax.f32 %v300_v61, 0.0 }
 0x136   :  { %v304_v0 = vpop.f32.mrb[40].mxu0 }
 0x137   :  { %373 = vst.msk [vmem:[%s1986_s6 + $0x98] sm:$0xff] %vm353_vm2, %v347_v63  ;;  %v305_v1 = vadd.f32 %v1552_v45, %v304_v0  ;;  %v1106_v2 = vpop.f32.mrb[41].mxu0  ;;  %1185 = vmatmul.mubr.msk.f32.gmra.mrb[38].mxu1 %vm353_vm2, %v347_v63 }
 0x138   :  { %1187 = vmatprep.mubr.msk.f32.mxu1 %vm1324_vm0, %v1325_v4 }
 0x139   :  { %v348_v3 = vmax.f32 %v305_v1, 0.0 }
 0x13a   :  { %v309_v5 = vpop.f32.mrb[42].mxu0 }
 0x13b   :  { %374 = vst.msk [vmem:[%s1986_s6 + $0xa0] sm:$0xff] %vm353_vm2, %v348_v3  ;;  %v310_v6 = vadd.f32 %v1552_v45, %v309_v5  ;;  %v1109_v7 = vpop.f32.mrb[43].mxu0  ;;  %1188 = vmatmul.mubr.msk.f32.gmra.mrb[40].mxu1 %vm353_vm2, %v348_v3 }
 0x13c   :  { %1190 = vmatprep.mubr.msk.f32.mxu1 %vm1324_vm0, %v1325_v4 }
 0x13d   :  { %v349_v8 = vmax.f32 %v310_v6, 0.0 }
 0x13e   :  { %v314_v9 = vpop.f32.mrb[44].mxu0 }
 0x13f   :  { %375 = vst.msk [vmem:[%s1986_s6 + $0xa8] sm:$0xff] %vm353_vm2, %v349_v8  ;;  %v315_v10 = vadd.f32 %v1552_v45, %v314_v9  ;;  %v1112_v11 = vpop.f32.mrb[45].mxu0  ;;  %1191 = vmatmul.mubr.msk.f32.gmra.mrb[42].mxu1 %vm353_vm2, %v349_v8 }
 0x140   :  { %1193 = vmatprep.mubr.msk.f32.mxu1 %vm1324_vm0, %v1325_v4 }
 0x141   :  { %v350_v12 = vmax.f32 %v315_v10, 0.0 }
 0x142   :  { %v319_v13 = vpop.f32.mrb[46].mxu0 }
 0x143   :  { %376 = vst.msk [vmem:[%s1986_s6 + $0xb0] sm:$0xff] %vm353_vm2, %v350_v12  ;;  %v320_v14 = vadd.f32 %v1552_v45, %v319_v13  ;;  %v1115_v15 = vpop.f32.mrb[47].mxu0  ;;  %1194 = vmatmul.mubr.msk.f32.gmra.mrb[44].mxu1 %vm353_vm2, %v350_v12 }
 0x144   :  { %1196 = vmatprep.mubr.msk.f32.mxu1 %vm1324_vm0, %v1325_v4 }
 0x145   :  { %v351_v16 = vmax.f32 %v320_v14, 0.0 }
 0x146   :  { %v324_v17 = vpop.f32.mrb[48].mxu0 }
 0x147   :  { %377 = vst.msk [vmem:[%s1986_s6 + $0xb8] sm:$0xff] %vm353_vm2, %v351_v16  ;;  %v325_v18 = vadd.f32 %v1552_v45, %v324_v17  ;;  %v1118_v19 = vpop.f32.mrb[49].mxu0  ;;  %1197 = vmatmul.mubr.msk.f32.gmra.mrb[46].mxu1 %vm353_vm2, %v351_v16 }
 0x148   :  { %1199 = vmatprep.mubr.msk.f32.mxu1 %vm1324_vm0, %v1325_v4 }
 0x149   :  { %v352_v20 = vmax.f32 %v325_v18, 0.0 }
 0x14b   :  { %378 = vst.msk [vmem:[%s1986_s6 + $0xc0] sm:$0xff] %vm353_vm2, %v352_v20  ;;  %1200 = vmatmul.mubr.msk.f32.gmra.mrb[48].mxu1 %vm353_vm2, %v352_v20 }
 0x1be   :  { %v531_v45 = vpop.f32.mrb[0].mxu1 }
 0x1bf   :  { %v1758_v22 = vadd.f32 %v1755_v21, %v531_v45  ;;  %v1129_v23 = vpop.f32.mrb[1].mxu1 }
 0x1c1   :  { %v655_v4 = vand.u32 2147483647, %v1758_v22  ;;  %vm805_vm3 = vcmp.ge.f32.partialorder %v1758_v22, 0.0 }
 0x1c2   :  { %v536_v24 = vpop.f32.mrb[2].mxu1 }
 0x1c3   :  { %v680_v25 = vsub.f32 0.0, %v655_v4  ;;  %v1762_v26 = vadd.f32 %v1755_v21, %v536_v24  ;;  %v1132_v27 = vpop.f32.mrb[3].mxu1 }
 0x1c5   :  { %v705_v28 = vmul.f32 1.442695, %v680_v25  ;;  %v656_v29 = vand.u32 2147483647, %v1762_v26  ;;  %vm806_vm5 = vcmp.ge.f32.partialorder %v1762_v26, 0.0 }
 0x1c6   :  { %v541_v30 = vpop.f32.mrb[4].mxu1 }
 0x1c7   :  { %1223 = vpow2.f32 %v705_v28  ;;  %v681_v31 = vsub.f32 0.0, %v656_v29  ;;  %v1766_v32 = vadd.f32 %v1755_v21, %v541_v30  ;;  %v1135_v33 = vpop.f32.mrb[5].mxu1 }
 0x1c9   :  { %v707_v34 = vmul.f32 1.442695, %v681_v31  ;;  %v657_v35 = vand.u32 2147483647, %v1766_v32  ;;  %vm807_vm6 = vcmp.ge.f32.partialorder %v1766_v32, 0.0 }
 0x1ca   :  { %v546_v36 = vpop.f32.mrb[6].mxu1 }
 0x1cb   :  { %1225 = vpow2.f32 %v707_v34  ;;  %v682_v37 = vsub.f32 0.0, %v657_v35  ;;  %v1770_v38 = vadd.f32 %v1755_v21, %v546_v36  ;;  %v1138_v39 = vpop.f32.mrb[7].mxu1 }
 0x1cd   :  { %v709_v40 = vmul.f32 1.442695, %v682_v37  ;;  %v658_v41 = vand.u32 2147483647, %v1770_v38  ;;  %vm808_vm7 = vcmp.ge.f32.partialorder %v1770_v38, 0.0 }
 0x1ce   :  { %v551_v42 = vpop.f32.mrb[8].mxu1 }
 0x1cf   :  { %1227 = vpow2.f32 %v709_v40  ;;  %v683_v43 = vsub.f32 0.0, %v658_v41  ;;  %v1774_v44 = vadd.f32 %v1755_v21, %v551_v42  ;;  %v1141_v46 = vpop.f32.mrb[9].mxu1 }
 0x1d1   :  { %v1224_v47 = vpop.eup %1223  ;;  %v711_v48 = vmul.f32 1.442695, %v683_v43  ;;  %v659_v49 = vand.u32 2147483647, %v1774_v44  ;;  %vm809_vm8 = vcmp.ge.f32.partialorder %v1774_v44, 0.0 }
 0x1d2   :  { %v755_v50 = vadd.f32 1.0, %v1224_v47  ;;  %v556_v51 = vpop.f32.mrb[10].mxu1  ;;  %v830_v12 = vsel %vm805_vm3, 1.0, %v1224_v47 }
 0x1d3   :  { %1229 = vpow2.f32 %v711_v48  ;;  %v684_v52 = vsub.f32 0.0, %v659_v49  ;;  %v1778_v53 = vadd.f32 %v1755_v21, %v556_v51  ;;  %v1144_v54 = vpop.f32.mrb[11].mxu1 }
 0x1d4   :  { %1231 = vrcp.f32 %v755_v50 }
 0x1d5   :  { %v1226_v55 = vpop.eup %1225  ;;  %v713_v56 = vmul.f32 1.442695, %v684_v52  ;;  %v660_v57 = vand.u32 2147483647, %v1778_v53  ;;  %vm810_vm9 = vcmp.ge.f32.partialorder %v1778_v53, 0.0 }
 0x1d6   :  { %v756_v58 = vadd.f32 1.0, %v1226_v55  ;;  %v561_v59 = vpop.f32.mrb[12].mxu1  ;;  %v831_v23 = vsel %vm806_vm5, 1.0, %v1226_v55 }
 0x1d7   :  { %1233 = vpow2.f32 %v713_v56  ;;  %v685_v60 = vsub.f32 0.0, %v660_v57  ;;  %v1782_v61 = vadd.f32 %v1755_v21, %v561_v59  ;;  %v1147_v62 = vpop.f32.mrb[13].mxu1 }
 0x1d8   :  { %1235 = vrcp.f32 %v756_v58 }
 0x1d9   :  { %v1228_v63 = vpop.eup %1227  ;;  %v715_v0 = vmul.f32 1.442695, %v685_v60  ;;  %v661_v1 = vand.u32 2147483647, %v1782_v61  ;;  %vm811_vm10 = vcmp.ge.f32.partialorder %v1782_v61, 0.0 }
 0x1da   :  { %v757_v2 = vadd.f32 1.0, %v1228_v63  ;;  %v566_v3 = vpop.f32.mrb[14].mxu1  ;;  %v832_v34 = vsel %vm807_vm6, 1.0, %v1228_v63 }
 0x1db   :  { %1237 = vpow2.f32 %v715_v0  ;;  %v686_v5 = vsub.f32 0.0, %v661_v1  ;;  %v1786_v6 = vadd.f32 %v1755_v21, %v566_v3  ;;  %v1150_v7 = vpop.f32.mrb[15].mxu1 }
 0x1dc   :  { %1239 = vrcp.f32 %v757_v2 }
 0x1dd   :  { %v1230_v8 = vpop.eup %1229  ;;  %v717_v9 = vmul.f32 1.442695, %v686_v5  ;;  %v662_v10 = vand.u32 2147483647, %v1786_v6  ;;  %vm812_vm11 = vcmp.ge.f32.partialorder %v1786_v6, 0.0 }
 0x1de   :  { %v1232_v11 = vpop.eup %1231  ;;  %v758_v13 = vadd.f32 1.0, %v1230_v8  ;;  %v571_v14 = vpop.f32.mrb[16].mxu1  ;;  %v833_v47 = vsel %vm808_vm7, 1.0, %v1230_v8 }
 0x1df   :  { %v855_v15 = vmul.f32 %v1232_v11, %v830_v12  ;;  %1241 = vpow2.f32 %v717_v9  ;;  %v687_v16 = vsub.f32 0.0, %v662_v10  ;;  %v1791_v17 = vadd.f32 %v1755_v21, %v571_v14  ;;  %v1153_v18 = vpop.f32.mrb[17].mxu1 }
 0x1e0   :  { %1243 = vrcp.f32 %v758_v13 }
 0x1e1   :  { %v1234_v19 = vpop.eup %1233  ;;  %881 = vst.msk [vmem:[%s1988_s5] sm:$0xff] %vm880_vm4, %v855_v15  ;;  %v719_v20 = vmul.f32 1.442695, %v687_v16  ;;  %v663_v45 = vand.u32 2147483647, %v1791_v17  ;;  %vm813_vm12 = vcmp.ge.f32.partialorder %v1791_v17, 0.0 }
 0x1e2   :  { %v1236_v22 = vpop.eup %1235  ;;  %v759_v4 = vadd.f32 1.0, %v1234_v19  ;;  %v576_v24 = vpop.f32.mrb[18].mxu1  ;;  %v834_v58 = vsel %vm809_vm8, 1.0, %v1234_v19 }
 0x1e3   :  { %v856_v25 = vmul.f32 %v1236_v22, %v831_v23  ;;  %1245 = vpow2.f32 %v719_v20  ;;  %v688_v27 = vsub.f32 0.0, %v663_v45  ;;  %v1800_v28 = vadd.f32 %v1755_v21, %v576_v24  ;;  %v1156_v29 = vpop.f32.mrb[19].mxu1 }
 0x1e4   :  { %1247 = vrcp.f32 %v759_v4 }
 0x1e5   :  { %v1238_v30 = vpop.eup %1237  ;;  %882 = vst.msk [vmem:[%s1988_s5 + $0x8] sm:$0xff] %vm880_vm4, %v856_v25  ;;  %v721_v26 = vmul.f32 1.442695, %v688_v27  ;;  %v664_v31 = vand.u32 2147483647, %v1800_v28  ;;  %vm814_vm13 = vcmp.ge.f32.partialorder %v1800_v28, 0.0 }
 0x1e6   :  { %v1240_v33 = vpop.eup %1239  ;;  %v760_v35 = vadd.f32 1.0, %v1238_v30  ;;  %v581_v36 = vpop.f32.mrb[20].mxu1  ;;  %v835_v7 = vsel %vm810_vm9, 1.0, %v1238_v30 }
 0x1e7   :  { %v857_v37 = vmul.f32 %v1240_v33, %v832_v34  ;;  %1249 = vpow2.f32 %v721_v26  ;;  %v689_v39 = vsub.f32 0.0, %v664_v31  ;;  %v1809_v40 = vadd.f32 %v1755_v21, %v581_v36  ;;  %v1159_v41 = vpop.f32.mrb[21].mxu1 }
 0x1e8   :  { %1251 = vrcp.f32 %v760_v35 }
 0x1e9   :  { %v1242_v42 = vpop.eup %1241  ;;  %883 = vst.msk [vmem:[%s1988_s5 + $0x10] sm:$0xff] %vm880_vm4, %v857_v37  ;;  %v723_v32 = vmul.f32 1.442695, %v689_v39  ;;  %v665_v43 = vand.u32 2147483647, %v1809_v40  ;;  %vm815_vm14 = vcmp.ge.f32.partialorder %v1809_v40, 0.0 }
 0x1ea   :  { %v1244_v46 = vpop.eup %1243  ;;  %v761_v48 = vadd.f32 1.0, %v1242_v42  ;;  %v586_v49 = vpop.f32.mrb[22].mxu1  ;;  %v836_v18 = vsel %vm811_vm10, 1.0, %v1242_v42 }
 0x1eb   :  { %v858_v50 = vmul.f32 %v1244_v46, %v833_v47  ;;  %1253 = vpow2.f32 %v723_v32  ;;  %v690_v51 = vsub.f32 0.0, %v665_v43  ;;  %v1818_v52 = vadd.f32 %v1755_v21, %v586_v49  ;;  %v1162_v54 = vpop.f32.mrb[23].mxu1 }
 0x1ec   :  { %1255 = vrcp.f32 %v761_v48 }
 0x1ed   :  { %v1246_v55 = vpop.eup %1245  ;;  %884 = vst.msk [vmem:[%s1988_s5 + $0x18] sm:$0xff] %vm880_vm4, %v858_v50  ;;  %v725_v38 = vmul.f32 1.442695, %v690_v51  ;;  %v666_v56 = vand.u32 2147483647, %v1818_v52  ;;  %vm816_vm15 = vcmp.ge.f32.partialorder %v1818_v52, 0.0 }
 0x1ee   :  { %v1248_v57 = vpop.eup %1247  ;;  %v762_v59 = vadd.f32 1.0, %v1246_v55  ;;  %v591_v60 = vpop.f32.mrb[24].mxu1  ;;  %v837_v29 = vsel %vm812_vm11, 1.0, %v1246_v55 }
 0x1ef   :  { %v859_v62 = vmul.f32 %v1248_v57, %v834_v58  ;;  %1257 = vpow2.f32 %v725_v38  ;;  %v691_v63 = vsub.f32 0.0, %v666_v56  ;;  %v1827_v0 = vadd.f32 %v1755_v21, %v591_v60  ;;  %v1165_v1 = vpop.f32.mrb[25].mxu1 }
 0x1f0   :  { %1259 = vrcp.f32 %v762_v59 }
 0x1f1   :  { %v1250_v2 = vpop.eup %1249  ;;  %885 = vst.msk [vmem:[%s1988_s5 + $0x20] sm:$0xff] %vm880_vm4, %v859_v62  ;;  %v727_v44 = vmul.f32 1.442695, %v691_v63  ;;  %v667_v3 = vand.u32 2147483647, %v1827_v0  ;;  %vm817_vm0 = vcmp.ge.f32.partialorder %v1827_v0, 0.0 }
 0x1f2   :  { %v1252_v5 = vpop.eup %1251  ;;  %v763_v8 = vadd.f32 1.0, %v1250_v2  ;;  %v596_v9 = vpop.f32.mrb[26].mxu1  ;;  %v838_v41 = vsel %vm813_vm12, 1.0, %v1250_v2 }
 0x1f3   :  { %v860_v10 = vmul.f32 %v1252_v5, %v835_v7  ;;  %1261 = vpow2.f32 %v727_v44  ;;  %v692_v11 = vsub.f32 0.0, %v667_v3  ;;  %v1836_v12 = vadd.f32 %v1755_v21, %v596_v9  ;;  %v1168_v13 = vpop.f32.mrb[27].mxu1 }
 0x1f4   :  { %1263 = vrcp.f32 %v763_v8 }
 0x1f5   :  { %v1254_v14 = vpop.eup %1253  ;;  %886 = vst.msk [vmem:[%s1988_s5 + $0x28] sm:$0xff] %vm880_vm4, %v860_v10  ;;  %v729_v53 = vmul.f32 1.442695, %v692_v11  ;;  %v668_v15 = vand.u32 2147483647, %v1836_v12  ;;  %vm818_vm1 = vcmp.ge.f32.partialorder %v1836_v12, 0.0 }
 0x1f6   :  { %v1256_v16 = vpop.eup %1255  ;;  %v764_v19 = vadd.f32 1.0, %v1254_v14  ;;  %v601_v20 = vpop.f32.mrb[28].mxu1  ;;  %v839_v54 = vsel %vm814_vm13, 1.0, %v1254_v14 }
 0x1f7   :  { %v861_v45 = vmul.f32 %v1256_v16, %v836_v18  ;;  %1265 = vpow2.f32 %v729_v53  ;;  %v693_v22 = vsub.f32 0.0, %v668_v15  ;;  %v1845_v23 = vadd.f32 %v1755_v21, %v601_v20  ;;  %v1171_v4 = vpop.f32.mrb[29].mxu1 }
 0x1f8   :  { %1267 = vrcp.f32 %v764_v19 }
 0x1f9   :  { %v1258_v24 = vpop.eup %1257  ;;  %887 = vst.msk [vmem:[%s1988_s5 + $0x30] sm:$0xff] %vm880_vm4, %v861_v45  ;;  %v731_v61 = vmul.f32 1.442695, %v693_v22  ;;  %v669_v25 = vand.u32 2147483647, %v1845_v23  ;;  %vm819_vm2 = vcmp.ge.f32.partialorder %v1845_v23, 0.0 }
 0x1fa   :  { %v1260_v27 = vpop.eup %1259  ;;  %v765_v30 = vadd.f32 1.0, %v1258_v24  ;;  %v606_v26 = vpop.f32.mrb[30].mxu1  ;;  %v840_v1 = vsel %vm815_vm14, 1.0, %v1258_v24 }
 0x1fb   :  { %v862_v31 = vmul.f32 %v1260_v27, %v837_v29  ;;  %1269 = vpow2.f32 %v731_v61  ;;  %v694_v33 = vsub.f32 0.0, %v669_v25  ;;  %v1854_v34 = vadd.f32 %v1755_v21, %v606_v26  ;;  %v1174_v35 = vpop.f32.mrb[31].mxu1 }
 0x1fc   :  { %1271 = vrcp.f32 %v765_v30 }
 0x1fd   :  { %v1262_v36 = vpop.eup %1261  ;;  %888 = vst.msk [vmem:[%s1988_s5 + $0x38] sm:$0xff] %vm880_vm4, %v862_v31  ;;  %v733_v6 = vmul.f32 1.442695, %v694_v33  ;;  %v670_v37 = vand.u32 2147483647, %v1854_v34  ;;  %vm820_vm3 = vcmp.ge.f32.partialorder %v1854_v34, 0.0 }
 0x1fe   :  { %v1264_v39 = vpop.eup %1263  ;;  %v766_v42 = vadd.f32 1.0, %v1262_v36  ;;  %v611_v32 = vpop.f32.mrb[32].mxu1  ;;  %v841_v13 = vsel %vm816_vm15, 1.0, %v1262_v36 }
 0x1ff   :  { %v863_v43 = vmul.f32 %v1264_v39, %v838_v41  ;;  %1273 = vpow2.f32 %v733_v6  ;;  %v695_v46 = vsub.f32 0.0, %v670_v37  ;;  %v1863_v47 = vadd.f32 %v1755_v21, %v611_v32  ;;  %v1177_v48 = vpop.f32.mrb[33].mxu1 }
 0x200   :  { %1275 = vrcp.f32 %v766_v42 }
 0x201   :  { %v1266_v49 = vpop.eup %1265  ;;  %889 = vst.msk [vmem:[%s1988_s5 + $0x40] sm:$0xff] %vm880_vm4, %v863_v43  ;;  %v735_v17 = vmul.f32 1.442695, %v695_v46  ;;  %v671_v50 = vand.u32 2147483647, %v1863_v47  ;;  %vm821_vm5 = vcmp.ge.f32.partialorder %v1863_v47, 0.0 }
 0x202   :  { %v1268_v51 = vpop.eup %1267  ;;  %v767_v55 = vadd.f32 1.0, %v1266_v49  ;;  %v616_v38 = vpop.f32.mrb[34].mxu1  ;;  %v842_v4 = vsel %vm817_vm0, 1.0, %v1266_v49 }
 0x203   :  { %v864_v56 = vmul.f32 %v1268_v51, %v839_v54  ;;  %1277 = vpow2.f32 %v735_v17  ;;  %v696_v57 = vsub.f32 0.0, %v671_v50  ;;  %v1872_v58 = vadd.f32 %v1755_v21, %v616_v38  ;;  %v1180_v59 = vpop.f32.mrb[35].mxu1 }
 0x204   :  { %1279 = vrcp.f32 %v767_v55 }
 0x205   :  { %v1270_v60 = vpop.eup %1269  ;;  %890 = vst.msk [vmem:[%s1988_s5 + $0x48] sm:$0xff] %vm880_vm4, %v864_v56  ;;  %v737_v28 = vmul.f32 1.442695, %v696_v57  ;;  %v672_v62 = vand.u32 2147483647, %v1872_v58  ;;  %vm822_vm6 = vcmp.ge.f32.partialorder %v1872_v58, 0.0 }
 0x206   :  { %v1272_v63 = vpop.eup %1271  ;;  %v768_v2 = vadd.f32 1.0, %v1270_v60  ;;  %v621_v44 = vpop.f32.mrb[36].mxu1  ;;  %v843_v35 = vsel %vm818_vm1, 1.0, %v1270_v60 }
 0x207   :  { %v865_v3 = vmul.f32 %v1272_v63, %v840_v1  ;;  %1281 = vpow2.f32 %v737_v28  ;;  %v697_v5 = vsub.f32 0.0, %v672_v62  ;;  %v1881_v7 = vadd.f32 %v1755_v21, %v621_v44  ;;  %v1183_v8 = vpop.f32.mrb[37].mxu1 }
 0x208   :  { %1283 = vrcp.f32 %v768_v2 }
 0x209   :  { %v1274_v9 = vpop.eup %1273  ;;  %891 = vst.msk [vmem:[%s1988_s5 + $0x50] sm:$0xff] %vm880_vm4, %v865_v3  ;;  %v739_v40 = vmul.f32 1.442695, %v697_v5  ;;  %v673_v10 = vand.u32 2147483647, %v1881_v7  ;;  %vm823_vm7 = vcmp.ge.f32.partialorder %v1881_v7, 0.0 }
 0x20a   :  { %v1276_v11 = vpop.eup %1275  ;;  %v769_v14 = vadd.f32 1.0, %v1274_v9  ;;  %v626_v53 = vpop.f32.mrb[38].mxu1  ;;  %v844_v48 = vsel %vm819_vm2, 1.0, %v1274_v9 }
 0x20b   :  { %v866_v15 = vmul.f32 %v1276_v11, %v841_v13  ;;  %1285 = vpow2.f32 %v739_v40  ;;  %v698_v16 = vsub.f32 0.0, %v673_v10  ;;  %v1890_v18 = vadd.f32 %v1755_v21, %v626_v53  ;;  %v1186_v19 = vpop.f32.mrb[39].mxu1 }
 0x20c   :  { %1287 = vrcp.f32 %v769_v14 }
 0x20d   :  { %v1278_v20 = vpop.eup %1277  ;;  %892 = vst.msk [vmem:[%s1988_s5 + $0x58] sm:$0xff] %vm880_vm4, %v866_v15  ;;  %v741_v52 = vmul.f32 1.442695, %v698_v16  ;;  %v674_v45 = vand.u32 2147483647, %v1890_v18  ;;  %vm824_vm8 = vcmp.ge.f32.partialorder %v1890_v18, 0.0 }
 0x20e   :  { %v1280_v22 = vpop.eup %1279  ;;  %v770_v24 = vadd.f32 1.0, %v1278_v20  ;;  %v631_v61 = vpop.f32.mrb[40].mxu1  ;;  %v845_v59 = vsel %vm820_vm3, 1.0, %v1278_v20 }
 0x20f   :  { %v867_v25 = vmul.f32 %v1280_v22, %v842_v4  ;;  %1289 = vpow2.f32 %v741_v52  ;;  %v699_v27 = vsub.f32 0.0, %v674_v45  ;;  %v1899_v29 = vadd.f32 %v1755_v21, %v631_v61  ;;  %v1189_v30 = vpop.f32.mrb[41].mxu1 }
 0x210   :  { %1291 = vrcp.f32 %v770_v24 }
 0x211   :  { %v1282_v26 = vpop.eup %1281  ;;  %893 = vst.msk [vmem:[%s1988_s5 + $0x60] sm:$0xff] %vm880_vm4, %v867_v25  ;;  %v743_v0 = vmul.f32 1.442695, %v699_v27  ;;  %v675_v31 = vand.u32 2147483647, %v1899_v29  ;;  %vm825_vm9 = vcmp.ge.f32.partialorder %v1899_v29, 0.0 }
 0x212   :  { %v1284_v33 = vpop.eup %1283  ;;  %v771_v36 = vadd.f32 1.0, %v1282_v26  ;;  %v636_v6 = vpop.f32.mrb[42].mxu1  ;;  %v846_v8 = vsel %vm821_vm5, 1.0, %v1282_v26 }
 0x213   :  { %v868_v37 = vmul.f32 %v1284_v33, %v843_v35  ;;  %1293 = vpow2.f32 %v743_v0  ;;  %v700_v39 = vsub.f32 0.0, %v675_v31  ;;  %v1908_v41 = vadd.f32 %v1755_v21, %v636_v6  ;;  %v1192_v42 = vpop.f32.mrb[43].mxu1 }
 0x214   :  { %1295 = vrcp.f32 %v771_v36 }
 0x215   :  { %v1286_v32 = vpop.eup %1285  ;;  %894 = vst.msk [vmem:[%s1988_s5 + $0x68] sm:$0xff] %vm880_vm4, %v868_v37  ;;  %v745_v12 = vmul.f32 1.442695, %v700_v39  ;;  %v676_v43 = vand.u32 2147483647, %v1908_v41  ;;  %vm826_vm10 = vcmp.ge.f32.partialorder %v1908_v41, 0.0 }
 0x216   :  { %v1288_v46 = vpop.eup %1287  ;;  %v772_v49 = vadd.f32 1.0, %v1286_v32  ;;  %v641_v17 = vpop.f32.mrb[44].mxu1  ;;  %v847_v19 = vsel %vm822_vm6, 1.0, %v1286_v32 }
 0x217   :  { %v869_v50 = vmul.f32 %v1288_v46, %v844_v48  ;;  %1297 = vpow2.f32 %v745_v12  ;;  %v701_v51 = vsub.f32 0.0, %v676_v43  ;;  %v1917_v54 = vadd.f32 %v1755_v21, %v641_v17  ;;  %v1195_v55 = vpop.f32.mrb[45].mxu1 }
 0x218   :  { %1299 = vrcp.f32 %v772_v49 }
 0x219   :  { %v1290_v38 = vpop.eup %1289  ;;  %895 = vst.msk [vmem:[%s1988_s5 + $0x70] sm:$0xff] %vm880_vm4, %v869_v50  ;;  %v747_v23 = vmul.f32 1.442695, %v701_v51  ;;  %v677_v56 = vand.u32 2147483647, %v1917_v54  ;;  %vm827_vm11 = vcmp.ge.f32.partialorder %v1917_v54, 0.0 }
 0x21a   :  { %v1292_v57 = vpop.eup %1291  ;;  %v773_v60 = vadd.f32 1.0, %v1290_v38  ;;  %v646_v28 = vpop.f32.mrb[46].mxu1  ;;  %v848_v4 = vsel %vm823_vm7, 1.0, %v1290_v38 }
 0x21b   :  { %v870_v62 = vmul.f32 %v1292_v57, %v845_v59  ;;  %1301 = vpow2.f32 %v747_v23  ;;  %v702_v63 = vsub.f32 0.0, %v677_v56  ;;  %v1926_v1 = vadd.f32 %v1755_v21, %v646_v28  ;;  %v1198_v2 = vpop.f32.mrb[47].mxu1 }
 0x21c   :  { %1303 = vrcp.f32 %v773_v60 }
 0x21d   :  { %v1294_v44 = vpop.eup %1293  ;;  %896 = vst.msk [vmem:[%s1988_s5 + $0x78] sm:$0xff] %vm880_vm4, %v870_v62  ;;  %v749_v34 = vmul.f32 1.442695, %v702_v63  ;;  %v678_v3 = vand.u32 2147483647, %v1926_v1  ;;  %vm828_vm12 = vcmp.ge.f32.partialorder %v1926_v1, 0.0 }
 0x21e   :  { %v1296_v5 = vpop.eup %1295  ;;  %v774_v9 = vadd.f32 1.0, %v1294_v44  ;;  %v651_v40 = vpop.f32.mrb[48].mxu1  ;;  %v849_v30 = vsel %vm824_vm8, 1.0, %v1294_v44 }
 0x21f   :  { %v871_v10 = vmul.f32 %v1296_v5, %v846_v8  ;;  %1305 = vpow2.f32 %v749_v34  ;;  %v703_v11 = vsub.f32 0.0, %v678_v3  ;;  %v1935_v13 = vadd.f32 %v1755_v21, %v651_v40  ;;  %v1201_v14 = vpop.f32.mrb[49].mxu1 }
 0x220   :  { %1307 = vrcp.f32 %v774_v9 }
 0x221   :  { %v1298_v53 = vpop.eup %1297  ;;  %897 = vst.msk [vmem:[%s1988_s5 + $0x80] sm:$0xff] %vm880_vm4, %v871_v10  ;;  %v751_v47 = vmul.f32 1.442695, %v703_v11  ;;  %v679_v15 = vand.u32 2147483647, %v1935_v13  ;;  %vm829_vm13 = vcmp.ge.f32.partialorder %v1935_v13, 0.0 }
 0x222   :  { %v1300_v16 = vpop.eup %1299  ;;  %v775_v20 = vadd.f32 1.0, %v1298_v53  ;;  %v850_v33 = vsel %vm825_vm9, 1.0, %v1298_v53 }
 0x223   :  { %v872_v52 = vmul.f32 %v1300_v16, %v847_v19  ;;  %1309 = vpow2.f32 %v751_v47  ;;  %v704_v21 = vsub.f32 0.0, %v679_v15 }
 0x224   :  { %1311 = vrcp.f32 %v775_v20 }
 0x225   :  { %v1302_v45 = vpop.eup %1301  ;;  %898 = vst.msk [vmem:[%s1988_s5 + $0x88] sm:$0xff] %vm880_vm4, %v872_v52  ;;  %v753_v22 = vmul.f32 1.442695, %v704_v21 }
 0x226   :  { %v1304_v58 = vpop.eup %1303  ;;  %v776_v24 = vadd.f32 1.0, %v1302_v45  ;;  %v851_v37 = vsel %vm826_vm10, 1.0, %v1302_v45 }
 0x227   :  { %v873_v61 = vmul.f32 %v1304_v58, %v848_v4  ;;  %1313 = vpow2.f32 %v753_v22 }
 0x228   :  { %1315 = vrcp.f32 %v776_v24 }
 0x229   :  { %v1306_v25 = vpop.eup %1305  ;;  %899 = vst.msk [vmem:[%s1988_s5 + $0x90] sm:$0xff] %vm880_vm4, %v873_v61 }
 0x22a   :  { %v1308_v27 = vpop.eup %1307  ;;  %v777_v26 = vadd.f32 1.0, %v1306_v25  ;;  %v852_v32 = vsel %vm827_vm11, 1.0, %v1306_v25 }
 0x22b   :  { %v874_v0 = vmul.f32 %v1308_v27, %v849_v30 }
 0x22c   :  { %1317 = vrcp.f32 %v777_v26 }
 0x22d   :  { %v1310_v7 = vpop.eup %1309  ;;  %900 = vst.msk [vmem:[%s1988_s5 + $0x98] sm:$0xff] %vm880_vm4, %v874_v0 }
 0x22e   :  { %v1312_v31 = vpop.eup %1311  ;;  %v778_v35 = vadd.f32 1.0, %v1310_v7  ;;  %v853_v43 = vsel %vm828_vm12, 1.0, %v1310_v7 }
 0x22f   :  { %v875_v36 = vmul.f32 %v1312_v31, %v850_v33 }
 0x230   :  { %1319 = vrcp.f32 %v778_v35 }
 0x231   :  { %v1314_v6 = vpop.eup %1313  ;;  %901 = vst.msk [vmem:[%s1988_s5 + $0xa0] sm:$0xff] %vm880_vm4, %v875_v36 }
 0x232   :  { %v1316_v18 = vpop.eup %1315  ;;  %v779_v39 = vadd.f32 1.0, %v1314_v6  ;;  %v854_v49 = vsel %vm829_vm13, 1.0, %v1314_v6 }
 0x233   :  { %v876_v42 = vmul.f32 %v1316_v18, %v851_v37 }
 0x234   :  { %1321 = vrcp.f32 %v779_v39 }
 0x235   :  { %902 = vst.msk [vmem:[%s1988_s5 + $0xa8] sm:$0xff] %vm880_vm4, %v876_v42 }
 0x236   :  { %v1318_v29 = vpop.eup %1317 }
 0x237   :  { %v877_v12 = vmul.f32 %v1318_v29, %v852_v32 }
 0x239   :  { %903 = vst.msk [vmem:[%s1988_s5 + $0xb0] sm:$0xff] %vm880_vm4, %v877_v12 }
 0x23a   :  { %v1320_v41 = vpop.eup %1319 }
 0x23b   :  { %v878_v46 = vmul.f32 %v1320_v41, %v853_v43 }
 0x23d   :  { %904 = vst.msk [vmem:[%s1988_s5 + $0xb8] sm:$0xff] %vm880_vm4, %v878_v46 }
 0x23e   :  { %v1322_v48 = vpop.eup %1321 }
 0x23f   :  { %v879_v17 = vmul.f32 %v1322_v48, %v854_v49 }
 0x241   :  { %905 = vst.msk [vmem:[%s1988_s5 + $0xc0] sm:$0xff] %vm880_vm4, %v879_v17 }

// kernel: tpu_custom_call.1
= control target key start
LH: loop header
LB: loop body
LE: loop exit
PB: predicated region body
PF: predicated region fallthrough
CT: control target
= control target key end

     0   :  { %v1323_v0 = vmov 0.0|0.0   ;;  %vm1324_vm0 = vmmov 0   ;;  %v1325_v4 = vmov 0.0   ;;  %vm62_vm1 = vcmask 523264   ;;  %s1982_s1 = inlined_call_operand.vmem [shape: f32[64,32], index: 1, kind: input, shape index: {}]   ;;  %s1983_s3 = inlined_call_operand.vmem [shape: f32[32,48], index: 3, kind: input, shape index: {}]   ;;  %s1984_s0 = inlined_call_operand.vmem [shape: f32[200,64], index: 0, kind: input, shape index: {}]   ;;  %s1985_s2 = inlined_call_operand.vmem [shape: f32[1,32], index: 2, kind: input, shape index: {}]   ;;  %s1986_s6 = inlined_call_operand.vmem [shape: f32[200,32], index: 6, kind: output, shape index: {1}]   ;;  %s1987_s4 = inlined_call_operand.vmem [shape: f32[1,48], index: 4, kind: input, shape index: {}]   ;;  %s1988_s5 = inlined_call_operand.vmem [shape: f32[200,48], index: 5, kind: output, shape index: {0}]  }
   0x1   :  { %1202 = vmatprep.subr.bf16.mxu0 %v1323_v0  ;;  %v47_v1 = vld [vmem:[%s1982_s1] sm:$0xff]  ;;  %v48_v2 = vld [vmem:[%s1982_s1 + $0x8] sm:$0xff]  ;;  %v49_v3 = vld [vmem:[%s1982_s1 + $0x10] sm:$0xff]  ;;  %1044 = vmatprep.mubr.msk.f32.mxu0 %vm1324_vm0, %v1325_v4  ;;  %vm353_vm2 = vcmask 261120   ;;  %vm880_vm4 = vcmask 392192  }
   0x2   :  { %v1203_v5 = vpack.c.bf16 %v48_v2, %v47_v1  ;;  %v50_v6 = vld [vmem:[%s1982_s1 + $0x18] sm:$0xff]  ;;  %1214 = vmatprep.subr.bf16.mxu1 %v1323_v0  ;;  %1127 = vmatprep.mubr.msk.f32.mxu1 %vm1324_vm0, %v1325_v4  ;;  %v51_v8 = vld [vmem:[%s1982_s1 + $0x20] sm:$0xff]  ;;  %v52_v9 = vld [vmem:[%s1982_s1 + $0x28] sm:$0xff] }
   0x3   :  { %v1206_v7 = vpack.c.bf16 %v50_v6, %v49_v3  ;;  %v1209_v10 = vpack.c.bf16 %v52_v9, %v51_v8  ;;  %v53_v11 = vld [vmem:[%s1982_s1 + $0x30] sm:$0xff]  ;;  %v54_v12 = vld [vmem:[%s1982_s1 + $0x38] sm:$0xff]  ;;  %v379_v14 = vld [vmem:[%s1983_s3] sm:$0xff] }
   0x4   :  { %1204 = vmatpush3.bf16.msra.mxu0 %v1203_v5  ;;  %v1212_v13 = vpack.c.bf16 %v54_v12, %v53_v11  ;;  %v380_v15 = vld [vmem:[%s1983_s3 + $0x8] sm:$0xff]  ;;  %v22_v17 = vld [vmem:[%s1984_s0] sm:$0xff]  ;;  %v24_v19 = vld [vmem:[%s1984_s0 + $0x10] sm:$0xff] }
   0x5   :  { %1205 = vmatprep.subr.bf16.mxu0 %v1323_v0  ;;  %v1215_v16 = vpack.c.bf16 %v380_v15, %v379_v14  ;;  %v23_v18 = vld [vmem:[%s1984_s0 + $0x8] sm:$0xff]  ;;  %v25_v20 = vld [vmem:[%s1984_s0 + $0x18] sm:$0xff]  ;;  %v26_v21 = vld [vmem:[%s1984_s0 + $0x20] sm:$0xff] }
   0x6   :  { %v27_v22 = vld [vmem:[%s1984_s0 + $0x28] sm:$0xff]  ;;  %v28_v23 = vld [vmem:[%s1984_s0 + $0x30] sm:$0xff]  ;;  %v29_v24 = vld [vmem:[%s1984_s0 + $0x38] sm:$0xff] }
   0x7   :  { %1216 = vmatpush3.bf16.msra.mxu1 %v1215_v16  ;;  %v30_v25 = vld [vmem:[%s1984_s0 + $0x40] sm:$0xff]  ;;  %v31_v26 = vld [vmem:[%s1984_s0 + $0x48] sm:$0xff]  ;;  %v32_v27 = vld [vmem:[%s1984_s0 + $0x50] sm:$0xff] }
   0x8   :  { %1207 = vmatpush3.bf16.msra.mxu0 %v1206_v7  ;;  %1217 = vmatprep.subr.bf16.mxu1 %v1323_v0  ;;  %v33_v28 = vld [vmem:[%s1984_s0 + $0x58] sm:$0xff]  ;;  %v34_v29 = vld [vmem:[%s1984_s0 + $0x60] sm:$0xff]  ;;  %v35_v30 = vld [vmem:[%s1984_s0 + $0x68] sm:$0xff] }
   0x9   :  { %1208 = vmatprep.subr.bf16.mxu0 %v1323_v0  ;;  %v36_v31 = vld [vmem:[%s1984_s0 + $0x70] sm:$0xff]  ;;  %v37_v32 = vld [vmem:[%s1984_s0 + $0x78] sm:$0xff]  ;;  %v38_v33 = vld [vmem:[%s1984_s0 + $0x80] sm:$0xff] }
   0xa   :  { %v39_v34 = vld [vmem:[%s1984_s0 + $0x88] sm:$0xff]  ;;  %v40_v35 = vld [vmem:[%s1984_s0 + $0x90] sm:$0xff]  ;;  %v41_v36 = vld [vmem:[%s1984_s0 + $0x98] sm:$0xff] }
   0xb   :  { %v42_v37 = vld [vmem:[%s1984_s0 + $0xa0] sm:$0xff]  ;;  %v43_v38 = vld [vmem:[%s1984_s0 + $0xa8] sm:$0xff]  ;;  %v381_v39 = vld [vmem:[%s1983_s3 + $0x10] sm:$0xff] }
   0xc   :  { %1210 = vmatpush3.bf16.msra.mxu0 %v1209_v10  ;;  %v382_v40 = vld [vmem:[%s1983_s3 + $0x18] sm:$0xff]  ;;  %v44_v42 = vld [vmem:[%s1984_s0 + $0xb0] sm:$0xff]  ;;  %v46_v44 = vld [vmem:[%s1984_s0 + $0xc0] sm:$0xff] }
   0xd   :  { %1211 = vmatprep.subr.bf16.mxu0 %v1323_v0  ;;  %v1218_v41 = vpack.c.bf16 %v382_v40, %v381_v39  ;;  %v45_v43 = vld [vmem:[%s1984_s0 + $0xb8] sm:$0xff]  ;;  %v1552_v45 = vld [vmem:[%s1985_s2] ss:$0 sm:$0xff] }
   0xf   :  { %1219 = vmatpush3.bf16.msra.mxu1 %v1218_v41 }
  0x10   :  { %1213 = vmatpush3.bf16.msra.mxu0 %v1212_v13 }
  0x13   :  { %1045 = vmatmul.mubr.msk.f32.vlgmr.msra.gmra.mrb[0].mxu0 %vm62_vm1, %v22_v17 }
  0x14   :  { %1047 = vmatprep.mubr.msk.f32.mxu0 %vm1324_vm0, %v1325_v4 }
  0x17   :  { %1048 = vmatmul.mubr.msk.f32.gmra.mrb[2].mxu0 %vm62_vm1, %v23_v18 }
  0x18   :  { %1050 = vmatprep.mubr.msk.f32.mxu0 %vm1324_vm0, %v1325_v4 }
  0x1b   :  { %1051 = vmatmul.mubr.msk.f32.gmra.mrb[4].mxu0 %vm62_vm1, %v24_v19 }
  0x1c   :  { %1053 = vmatprep.mubr.msk.f32.mxu0 %vm1324_vm0, %v1325_v4 }
  0x1f   :  { %1054 = vmatmul.mubr.msk.f32.gmra.mrb[6].mxu0 %vm62_vm1, %v25_v20 }
  0x20   :  { %1056 = vmatprep.mubr.msk.f32.mxu0 %vm1324_vm0, %v1325_v4 }
  0x23   :  { %1057 = vmatmul.mubr.msk.f32.gmra.mrb[8].mxu0 %vm62_vm1, %v26_v21 }
  0x24   :  { %1059 = vmatprep.mubr.msk.f32.mxu0 %vm1324_vm0, %v1325_v4 }
  0x27   :  { %1060 = vmatmul.mubr.msk.f32.gmra.mrb[10].mxu0 %vm62_vm1, %v27_v22 }
  0x28   :  { %1062 = vmatprep.mubr.msk.f32.mxu0 %vm1324_vm0, %v1325_v4 }
  0x2b   :  { %1063 = vmatmul.mubr.msk.f32.gmra.mrb[12].mxu0 %vm62_vm1, %v28_v23 }
  0x2c   :  { %1065 = vmatprep.mubr.msk.f32.mxu0 %vm1324_vm0, %v1325_v4 }
  0x2f   :  { %1066 = vmatmul.mubr.msk.f32.gmra.mrb[14].mxu0 %vm62_vm1, %v29_v24 }
  0x30   :  { %1068 = vmatprep.mubr.msk.f32.mxu0 %vm1324_vm0, %v1325_v4 }
  0x33   :  { %1069 = vmatmul.mubr.msk.f32.gmra.mrb[16].mxu0 %vm62_vm1, %v30_v25 }
  0x34   :  { %1071 = vmatprep.mubr.msk.f32.mxu0 %vm1324_vm0, %v1325_v4 }
  0x37   :  { %1072 = vmatmul.mubr.msk.f32.gmra.mrb[18].mxu0 %vm62_vm1, %v31_v26 }
  0x38   :  { %1074 = vmatprep.mubr.msk.f32.mxu0 %vm1324_vm0, %v1325_v4 }
  0x3b   :  { %1075 = vmatmul.mubr.msk.f32.gmra.mrb[20].mxu0 %vm62_vm1, %v32_v27 }
  0x3c   :  { %1077 = vmatprep.mubr.msk.f32.mxu0 %vm1324_vm0, %v1325_v4 }
  0x3f   :  { %1078 = vmatmul.mubr.msk.f32.gmra.mrb[22].mxu0 %vm62_vm1, %v33_v28 }
  0x40   :  { %1080 = vmatprep.mubr.msk.f32.mxu0 %vm1324_vm0, %v1325_v4 }
  0x43   :  { %1081 = vmatmul.mubr.msk.f32.gmra.mrb[24].mxu0 %vm62_vm1, %v34_v29 }
  0x44   :  { %1083 = vmatprep.mubr.msk.f32.mxu0 %vm1324_vm0, %v1325_v4 }
  0x47   :  { %1084 = vmatmul.mubr.msk.f32.gmra.mrb[26].mxu0 %vm62_vm1, %v35_v30 }
  0x48   :  { %1086 = vmatprep.mubr.msk.f32.mxu0 %vm1324_vm0, %v1325_v4 }
  0x4b   :  { %1087 = vmatmul.mubr.msk.f32.gmra.mrb[28].mxu0 %vm62_vm1, %v36_v31 }
  0x4c   :  { %1089 = vmatprep.mubr.msk.f32.mxu0 %vm1324_vm0, %v1325_v4 }
  0x4f   :  { %1090 = vmatmul.mubr.msk.f32.gmra.mrb[30].mxu0 %vm62_vm1, %v37_v32 }
  0x50   :  { %1092 = vmatprep.mubr.msk.f32.mxu0 %vm1324_vm0, %v1325_v4 }
  0x53   :  { %1093 = vmatmul.mubr.msk.f32.gmra.mrb[32].mxu0 %vm62_vm1, %v38_v33 }
  0x54   :  { %1095 = vmatprep.mubr.msk.f32.mxu0 %vm1324_vm0, %v1325_v4 }
  0x57   :  { %1096 = vmatmul.mubr.msk.f32.gmra.mrb[34].mxu0 %vm62_vm1, %v39_v34 }
  0x58   :  { %1098 = vmatprep.mubr.msk.f32.mxu0 %vm1324_vm0, %v1325_v4 }
  0x5b   :  { %1099 = vmatmul.mubr.msk.f32.gmra.mrb[36].mxu0 %vm62_vm1, %v40_v35 }
  0x5c   :  { %1101 = vmatprep.mubr.msk.f32.mxu0 %vm1324_vm0, %v1325_v4 }
  0x5f   :  { %1102 = vmatmul.mubr.msk.f32.gmra.mrb[38].mxu0 %vm62_vm1, %v41_v36 }
  0x60   :  { %1104 = vmatprep.mubr.msk.f32.mxu0 %vm1324_vm0, %v1325_v4 }
  0x63   :  { %1105 = vmatmul.mubr.msk.f32.gmra.mrb[40].mxu0 %vm62_vm1, %v42_v37 }
  0x64   :  { %1107 = vmatprep.mubr.msk.f32.mxu0 %vm1324_vm0, %v1325_v4 }
  0x67   :  { %1108 = vmatmul.mubr.msk.f32.gmra.mrb[42].mxu0 %vm62_vm1, %v43_v38 }
  0x68   :  { %1110 = vmatprep.mubr.msk.f32.mxu0 %vm1324_vm0, %v1325_v4 }
  0x6b   :  { %1111 = vmatmul.mubr.msk.f32.gmra.mrb[44].mxu0 %vm62_vm1, %v44_v42 }
  0x6c   :  { %1113 = vmatprep.mubr.msk.f32.mxu0 %vm1324_vm0, %v1325_v4 }
  0x6f   :  { %1114 = vmatmul.mubr.msk.f32.gmra.mrb[46].mxu0 %vm62_vm1, %v45_v43 }
  0x70   :  { %1116 = vmatprep.mubr.msk.f32.mxu0 %vm1324_vm0, %v1325_v4 }
  0x73   :  { %1117 = vmatmul.mubr.msk.f32.gmra.mrb[48].mxu0 %vm62_vm1, %v46_v44 }
  0xe6   :  { %v204_v46 = vpop.f32.mrb[0].mxu0 }
  0xe7   :  { %v205_v47 = vadd.f32 %v1552_v45, %v204_v46  ;;  %v1046_v48 = vpop.f32.mrb[1].mxu0 }
  0xe9   :  { %v328_v49 = vmax.f32 %v205_v47, 0.0 }
  0xea   :  { %v209_v50 = vpop.f32.mrb[2].mxu0 }
  0xeb   :  { %354 = vst.msk [vmem:[%s1986_s6] sm:$0xff] %vm353_vm2, %v328_v49  ;;  %v210_v51 = vadd.f32 %v1552_v45, %v209_v50  ;;  %v1049_v52 = vpop.f32.mrb[3].mxu0  ;;  %1128 = vmatmul.mubr.msk.f32.vlgmr.msra.gmra.mrb[0].mxu1 %vm353_vm2, %v328_v49 }
  0xec   :  { %1130 = vmatprep.mubr.msk.f32.mxu1 %vm1324_vm0, %v1325_v4 }
  0xed   :  { %v329_v53 = vmax.f32 %v210_v51, 0.0 }
  0xee   :  { %v214_v54 = vpop.f32.mrb[4].mxu0 }
  0xef   :  { %355 = vst.msk [vmem:[%s1986_s6 + $0x8] sm:$0xff] %vm353_vm2, %v329_v53  ;;  %v215_v55 = vadd.f32 %v1552_v45, %v214_v54  ;;  %v1052_v56 = vpop.f32.mrb[5].mxu0  ;;  %1131 = vmatmul.mubr.msk.f32.gmra.mrb[2].mxu1 %vm353_vm2, %v329_v53 }
  0xf0   :  { %1133 = vmatprep.mubr.msk.f32.mxu1 %vm1324_vm0, %v1325_v4 }
  0xf1   :  { %v330_v57 = vmax.f32 %v215_v55, 0.0 }
  0xf2   :  { %v219_v58 = vpop.f32.mrb[6].mxu0 }
  0xf3   :  { %356 = vst.msk [vmem:[%s1986_s6 + $0x10] sm:$0xff] %vm353_vm2, %v330_v57  ;;  %v220_v59 = vadd.f32 %v1552_v45, %v219_v58  ;;  %v1055_v60 = vpop.f32.mrb[7].mxu0  ;;  %1134 = vmatmul.mubr.msk.f32.gmra.mrb[4].mxu1 %vm353_vm2, %v330_v57 }
  0xf4   :  { %1136 = vmatprep.mubr.msk.f32.mxu1 %vm1324_vm0, %v1325_v4 }
  0xf5   :  { %v331_v61 = vmax.f32 %v220_v59, 0.0 }
  0xf6   :  { %v224_v62 = vpop.f32.mrb[8].mxu0 }
  0xf7   :  { %357 = vst.msk [vmem:[%s1986_s6 + $0x18] sm:$0xff] %vm353_vm2, %v331_v61  ;;  %v225_v63 = vadd.f32 %v1552_v45, %v224_v62  ;;  %v1058_v0 = vpop.f32.mrb[9].mxu0  ;;  %1137 = vmatmul.mubr.msk.f32.gmra.mrb[6].mxu1 %vm353_vm2, %v331_v61 }
  0xf8   :  { %1139 = vmatprep.mubr.msk.f32.mxu1 %vm1324_vm0, %v1325_v4 }
  0xf9   :  { %v332_v1 = vmax.f32 %v225_v63, 0.0 }
  0xfa   :  { %v229_v2 = vpop.f32.mrb[10].mxu0 }
  0xfb   :  { %358 = vst.msk [vmem:[%s1986_s6 + $0x20] sm:$0xff] %vm353_vm2, %v332_v1  ;;  %v230_v3 = vadd.f32 %v1552_v45, %v229_v2  ;;  %v1061_v5 = vpop.f32.mrb[11].mxu0  ;;  %1140 = vmatmul.mubr.msk.f32.gmra.mrb[8].mxu1 %vm353_vm2, %v332_v1 }
  0xfc   :  { %1142 = vmatprep.mubr.msk.f32.mxu1 %vm1324_vm0, %v1325_v4 }
  0xfd   :  { %v333_v6 = vmax.f32 %v230_v3, 0.0 }
  0xfe   :  { %v234_v7 = vpop.f32.mrb[12].mxu0 }
  0xff   :  { %359 = vst.msk [vmem:[%s1986_s6 + $0x28] sm:$0xff] %vm353_vm2, %v333_v6  ;;  %v235_v8 = vadd.f32 %v1552_v45, %v234_v7  ;;  %v1064_v9 = vpop.f32.mrb[13].mxu0  ;;  %1143 = vmatmul.mubr.msk.f32.gmra.mrb[10].mxu1 %vm353_vm2, %v333_v6 }
 0x100   :  { %1145 = vmatprep.mubr.msk.f32.mxu1 %vm1324_vm0, %v1325_v4 }
 0x101   :  { %v334_v10 = vmax.f32 %v235_v8, 0.0 }
 0x102   :  { %v239_v11 = vpop.f32.mrb[14].mxu0 }
 0x103   :  { %360 = vst.msk [vmem:[%s1986_s6 + $0x30] sm:$0xff] %vm353_vm2, %v334_v10  ;;  %v240_v12 = vadd.f32 %v1552_v45, %v239_v11  ;;  %v1067_v13 = vpop.f32.mrb[15].mxu0  ;;  %1146 = vmatmul.mubr.msk.f32.gmra.mrb[12].mxu1 %vm353_vm2, %v334_v10 }
 0x104   :  { %1148 = vmatprep.mubr.msk.f32.mxu1 %vm1324_vm0, %v1325_v4 }
 0x105   :  { %v335_v14 = vmax.f32 %v240_v12, 0.0 }
 0x106   :  { %v244_v15 = vpop.f32.mrb[16].mxu0 }
 0x107   :  { %361 = vst.msk [vmem:[%s1986_s6 + $0x38] sm:$0xff] %vm353_vm2, %v335_v14  ;;  %v245_v16 = vadd.f32 %v1552_v45, %v244_v15  ;;  %v1070_v17 = vpop.f32.mrb[17].mxu0  ;;  %1149 = vmatmul.mubr.msk.f32.gmra.mrb[14].mxu1 %vm353_vm2, %v335_v14 }
 0x108   :  { %1151 = vmatprep.mubr.msk.f32.mxu1 %vm1324_vm0, %v1325_v4 }
 0x109   :  { %v336_v18 = vmax.f32 %v245_v16, 0.0 }
 0x10a   :  { %v249_v19 = vpop.f32.mrb[18].mxu0 }
 0x10b   :  { %362 = vst.msk [vmem:[%s1986_s6 + $0x40] sm:$0xff] %vm353_vm2, %v336_v18  ;;  %v250_v20 = vadd.f32 %v1552_v45, %v249_v19  ;;  %v1073_v21 = vpop.f32.mrb[19].mxu0  ;;  %1152 = vmatmul.mubr.msk.f32.gmra.mrb[16].mxu1 %vm353_vm2, %v336_v18 }
 0x10c   :  { %1154 = vmatprep.mubr.msk.f32.mxu1 %vm1324_vm0, %v1325_v4  ;;  %v1755_v21 = vld [vmem:[%s1987_s4] ss:$0 sm:$0xff] }
 0x10d   :  { %v337_v22 = vmax.f32 %v250_v20, 0.0 }
 0x10e   :  { %v254_v23 = vpop.f32.mrb[20].mxu0 }
 0x10f   :  { %363 = vst.msk [vmem:[%s1986_s6 + $0x48] sm:$0xff] %vm353_vm2, %v337_v22  ;;  %v255_v24 = vadd.f32 %v1552_v45, %v254_v23  ;;  %v1076_v25 = vpop.f32.mrb[21].mxu0  ;;  %1155 = vmatmul.mubr.msk.f32.gmra.mrb[18].mxu1 %vm353_vm2, %v337_v22 }
 0x110   :  { %1157 = vmatprep.mubr.msk.f32.mxu1 %vm1324_vm0, %v1325_v4 }
 0x111   :  { %v338_v26 = vmax.f32 %v255_v24, 0.0 }
 0x112   :  { %v259_v27 = vpop.f32.mrb[22].mxu0 }
 0x113   :  { %364 = vst.msk [vmem:[%s1986_s6 + $0x50] sm:$0xff] %vm353_vm2, %v338_v26  ;;  %v260_v28 = vadd.f32 %v1552_v45, %v259_v27  ;;  %v1079_v29 = vpop.f32.mrb[23].mxu0  ;;  %1158 = vmatmul.mubr.msk.f32.gmra.mrb[20].mxu1 %vm353_vm2, %v338_v26 }
 0x114   :  { %1160 = vmatprep.mubr.msk.f32.mxu1 %vm1324_vm0, %v1325_v4 }
 0x115   :  { %v339_v30 = vmax.f32 %v260_v28, 0.0 }
 0x116   :  { %v264_v31 = vpop.f32.mrb[24].mxu0 }
 0x117   :  { %365 = vst.msk [vmem:[%s1986_s6 + $0x58] sm:$0xff] %vm353_vm2, %v339_v30  ;;  %v265_v32 = vadd.f32 %v1552_v45, %v264_v31  ;;  %v1082_v33 = vpop.f32.mrb[25].mxu0  ;;  %1161 = vmatmul.mubr.msk.f32.gmra.mrb[22].mxu1 %vm353_vm2, %v339_v30 }
 0x118   :  { %1163 = vmatprep.mubr.msk.f32.mxu1 %vm1324_vm0, %v1325_v4 }
 0x119   :  { %v340_v34 = vmax.f32 %v265_v32, 0.0 }
 0x11a   :  { %v269_v35 = vpop.f32.mrb[26].mxu0 }
 0x11b   :  { %366 = vst.msk [vmem:[%s1986_s6 + $0x60] sm:$0xff] %vm353_vm2, %v340_v34  ;;  %v270_v36 = vadd.f32 %v1552_v45, %v269_v35  ;;  %v1085_v37 = vpop.f32.mrb[27].mxu0  ;;  %1164 = vmatmul.mubr.msk.f32.gmra.mrb[24].mxu1 %vm353_vm2, %v340_v34 }
 0x11c   :  { %1166 = vmatprep.mubr.msk.f32.mxu1 %vm1324_vm0, %v1325_v4 }
 0x11d   :  { %v341_v38 = vmax.f32 %v270_v36, 0.0 }
 0x11e   :  { %v274_v39 = vpop.f32.mrb[28].mxu0 }
 0x11f   :  { %367 = vst.msk [vmem:[%s1986_s6 + $0x68] sm:$0xff] %vm353_vm2, %v341_v38  ;;  %v275_v40 = vadd.f32 %v1552_v45, %v274_v39  ;;  %v1088_v41 = vpop.f32.mrb[29].mxu0  ;;  %1167 = vmatmul.mubr.msk.f32.gmra.mrb[26].mxu1 %vm353_vm2, %v341_v38 }
 0x120   :  { %1169 = vmatprep.mubr.msk.f32.mxu1 %vm1324_vm0, %v1325_v4 }
 0x121   :  { %v342_v42 = vmax.f32 %v275_v40, 0.0 }
 0x122   :  { %v279_v43 = vpop.f32.mrb[30].mxu0 }
 0x123   :  { %368 = vst.msk [vmem:[%s1986_s6 + $0x70] sm:$0xff] %vm353_vm2, %v342_v42  ;;  %v280_v44 = vadd.f32 %v1552_v45, %v279_v43  ;;  %v1091_v46 = vpop.f32.mrb[31].mxu0  ;;  %1170 = vmatmul.mubr.msk.f32.gmra.mrb[28].mxu1 %vm353_vm2, %v342_v42 }
 0x124   :  { %1172 = vmatprep.mubr.msk.f32.mxu1 %vm1324_vm0, %v1325_v4 }
 0x125   :  { %v343_v47 = vmax.f32 %v280_v44, 0.0 }
 0x126   :  { %v284_v48 = vpop.f32.mrb[32].mxu0 }
 0x127   :  { %369 = vst.msk [vmem:[%s1986_s6 + $0x78] sm:$0xff] %vm353_vm2, %v343_v47  ;;  %v285_v49 = vadd.f32 %v1552_v45, %v284_v48  ;;  %v1094_v50 = vpop.f32.mrb[33].mxu0  ;;  %1173 = vmatmul.mubr.msk.f32.gmra.mrb[30].mxu1 %vm353_vm2, %v343_v47 }
 0x128   :  { %1175 = vmatprep.mubr.msk.f32.mxu1 %vm1324_vm0, %v1325_v4 }
 0x129   :  { %v344_v51 = vmax.f32 %v285_v49, 0.0 }
 0x12a   :  { %v289_v52 = vpop.f32.mrb[34].mxu0 }
 0x12b   :  { %370 = vst.msk [vmem:[%s1986_s6 + $0x80] sm:$0xff] %vm353_vm2, %v344_v51  ;;  %v290_v53 = vadd.f32 %v1552_v45, %v289_v52  ;;  %v1097_v54 = vpop.f32.mrb[35].mxu0  ;;  %1176 = vmatmul.mubr.msk.f32.gmra.mrb[32].mxu1 %vm353_vm2, %v344_v51 }
 0x12c   :  { %1178 = vmatprep.mubr.msk.f32.mxu1 %vm1324_vm0, %v1325_v4 }
 0x12d   :  { %v345_v55 = vmax.f32 %v290_v53, 0.0 }
 0x12e   :  { %v294_v56 = vpop.f32.mrb[36].mxu0 }
 0x12f   :  { %371 = vst.msk [vmem:[%s1986_s6 + $0x88] sm:$0xff] %vm353_vm2, %v345_v55  ;;  %v295_v57 = vadd.f32 %v1552_v45, %v294_v56  ;;  %v1100_v58 = vpop.f32.mrb[37].mxu0  ;;  %1179 = vmatmul.mubr.msk.f32.gmra.mrb[34].mxu1 %vm353_vm2, %v345_v55 }
 0x130   :  { %1181 = vmatprep.mubr.msk.f32.mxu1 %vm1324_vm0, %v1325_v4 }
 0x131   :  { %v346_v59 = vmax.f32 %v295_v57, 0.0 }
 0x132   :  { %v299_v60 = vpop.f32.mrb[38].mxu0 }
 0x133   :  { %372 = vst.msk [vmem:[%s1986_s6 + $0x90] sm:$0xff] %vm353_vm2, %v346_v59  ;;  %v300_v61 = vadd.f32 %v1552_v45, %v299_v60  ;;  %v1103_v62 = vpop.f32.mrb[39].mxu0  ;;  %1182 = vmatmul.mubr.msk.f32.gmra.mrb[36].mxu1 %vm353_vm2, %v346_v59 }
 0x134   :  { %1184 = vmatprep.mubr.msk.f32.mxu1 %vm1324_vm0, %v1325_v4 }
 0x135   :  { %v347_v63 = vmax.f32 %v300_v61, 0.0 }
 0x136   :  { %v304_v0 = vpop.f32.mrb[40].mxu0 }
 0x137   :  { %373 = vst.msk [vmem:[%s1986_s6 + $0x98] sm:$0xff] %vm353_vm2, %v347_v63  ;;  %v305_v1 = vadd.f32 %v1552_v45, %v304_v0  ;;  %v1106_v2 = vpop.f32.mrb[41].mxu0  ;;  %1185 = vmatmul.mubr.msk.f32.gmra.mrb[38].mxu1 %vm353_vm2, %v347_v63 }
 0x138   :  { %1187 = vmatprep.mubr.msk.f32.mxu1 %vm1324_vm0, %v1325_v4 }
 0x139   :  { %v348_v3 = vmax.f32 %v305_v1, 0.0 }
 0x13a   :  { %v309_v5 = vpop.f32.mrb[42].mxu0 }
 0x13b   :  { %374 = vst.msk [vmem:[%s1986_s6 + $0xa0] sm:$0xff] %vm353_vm2, %v348_v3  ;;  %v310_v6 = vadd.f32 %v1552_v45, %v309_v5  ;;  %v1109_v7 = vpop.f32.mrb[43].mxu0  ;;  %1188 = vmatmul.mubr.msk.f32.gmra.mrb[40].mxu1 %vm353_vm2, %v348_v3 }
 0x13c   :  { %1190 = vmatprep.mubr.msk.f32.mxu1 %vm1324_vm0, %v1325_v4 }
 0x13d   :  { %v349_v8 = vmax.f32 %v310_v6, 0.0 }
 0x13e   :  { %v314_v9 = vpop.f32.mrb[44].mxu0 }
 0x13f   :  { %375 = vst.msk [vmem:[%s1986_s6 + $0xa8] sm:$0xff] %vm353_vm2, %v349_v8  ;;  %v315_v10 = vadd.f32 %v1552_v45, %v314_v9  ;;  %v1112_v11 = vpop.f32.mrb[45].mxu0  ;;  %1191 = vmatmul.mubr.msk.f32.gmra.mrb[42].mxu1 %vm353_vm2, %v349_v8 }
 0x140   :  { %1193 = vmatprep.mubr.msk.f32.mxu1 %vm1324_vm0, %v1325_v4 }
 0x141   :  { %v350_v12 = vmax.f32 %v315_v10, 0.0 }
 0x142   :  { %v319_v13 = vpop.f32.mrb[46].mxu0 }
 0x143   :  { %376 = vst.msk [vmem:[%s1986_s6 + $0xb0] sm:$0xff] %vm353_vm2, %v350_v12  ;;  %v320_v14 = vadd.f32 %v1552_v45, %v319_v13  ;;  %v1115_v15 = vpop.f32.mrb[47].mxu0  ;;  %1194 = vmatmul.mubr.msk.f32.gmra.mrb[44].mxu1 %vm353_vm2, %v350_v12 }
 0x144   :  { %1196 = vmatprep.mubr.msk.f32.mxu1 %vm1324_vm0, %v1325_v4 }
 0x145   :  { %v351_v16 = vmax.f32 %v320_v14, 0.0 }
 0x146   :  { %v324_v17 = vpop.f32.mrb[48].mxu0 }
 0x147   :  { %377 = vst.msk [vmem:[%s1986_s6 + $0xb8] sm:$0xff] %vm353_vm2, %v351_v16  ;;  %v325_v18 = vadd.f32 %v1552_v45, %v324_v17  ;;  %v1118_v19 = vpop.f32.mrb[49].mxu0  ;;  %1197 = vmatmul.mubr.msk.f32.gmra.mrb[46].mxu1 %vm353_vm2, %v351_v16 }
 0x148   :  { %1199 = vmatprep.mubr.msk.f32.mxu1 %vm1324_vm0, %v1325_v4 }
 0x149   :  { %v352_v20 = vmax.f32 %v325_v18, 0.0 }
 0x14b   :  { %378 = vst.msk [vmem:[%s1986_s6 + $0xc0] sm:$0xff] %vm353_vm2, %v352_v20  ;;  %1200 = vmatmul.mubr.msk.f32.gmra.mrb[48].mxu1 %vm353_vm2, %v352_v20 }
 0x1be   :  { %v531_v45 = vpop.f32.mrb[0].mxu1 }
 0x1bf   :  { %v1758_v22 = vadd.f32 %v1755_v21, %v531_v45  ;;  %v1129_v23 = vpop.f32.mrb[1].mxu1 }
 0x1c1   :  { %v655_v4 = vand.u32 2147483647, %v1758_v22  ;;  %vm805_vm3 = vcmp.ge.f32.partialorder %v1758_v22, 0.0 }
 0x1c2   :  { %v536_v24 = vpop.f32.mrb[2].mxu1 }
 0x1c3   :  { %v680_v25 = vsub.f32 0.0, %v655_v4  ;;  %v1762_v26 = vadd.f32 %v1755_v21, %v536_v24  ;;  %v1132_v27 = vpop.f32.mrb[3].mxu1 }
 0x1c5   :  { %v705_v28 = vmul.f32 1.442695, %v680_v25  ;;  %v656_v29 = vand.u32 2147483647, %v1762_v26  ;;  %vm806_vm5 = vcmp.ge.f32.partialorder %v1762_v26, 0.0 }
 0x1c6   :  { %v541_v30 = vpop.f32.mrb[4].mxu1 }
 0x1c7   :  { %1223 = vpow2.f32 %v705_v28  ;;  %v681_v31 = vsub.f32 0.0, %v656_v29  ;;  %v1766_v32 = vadd.f32 %v1755_v21, %v541_v30  ;;  %v1135_v33 = vpop.f32.mrb[5].mxu1 }
 0x1c9   :  { %v707_v34 = vmul.f32 1.442695, %v681_v31  ;;  %v657_v35 = vand.u32 2147483647, %v1766_v32  ;;  %vm807_vm6 = vcmp.ge.f32.partialorder %v1766_v32, 0.0 }
 0x1ca   :  { %v546_v36 = vpop.f32.mrb[6].mxu1 }
 0x1cb   :  { %1225 = vpow2.f32 %v707_v34  ;;  %v682_v37 = vsub.f32 0.0, %v657_v35  ;;  %v1770_v38 = vadd.f32 %v1755_v21, %v546_v36  ;;  %v1138_v39 = vpop.f32.mrb[7].mxu1 }
 0x1cd   :  { %v709_v40 = vmul.f32 1.442695, %v682_v37  ;;  %v658_v41 = vand.u32 2147483647, %v1770_v38  ;;  %vm808_vm7 = vcmp.ge.f32.partialorder %v1770_v38, 0.0 }
 0x1ce   :  { %v551_v42 = vpop.f32.mrb[8].mxu1 }
 0x1cf   :  { %1227 = vpow2.f32 %v709_v40  ;;  %v683_v43 = vsub.f32 0.0, %v658_v41  ;;  %v1774_v44 = vadd.f32 %v1755_v21, %v551_v42  ;;  %v1141_v46 = vpop.f32.mrb[9].mxu1 }
 0x1d1   :  { %v1224_v47 = vpop.eup %1223  ;;  %v711_v48 = vmul.f32 1.442695, %v683_v43  ;;  %v659_v49 = vand.u32 2147483647, %v1774_v44  ;;  %vm809_vm8 = vcmp.ge.f32.partialorder %v1774_v44, 0.0 }
 0x1d2   :  { %v755_v50 = vadd.f32 1.0, %v1224_v47  ;;  %v556_v51 = vpop.f32.mrb[10].mxu1  ;;  %v830_v12 = vsel %vm805_vm3, 1.0, %v1224_v47 }
 0x1d3   :  { %1229 = vpow2.f32 %v711_v48  ;;  %v684_v52 = vsub.f32 0.0, %v659_v49  ;;  %v1778_v53 = vadd.f32 %v1755_v21, %v556_v51  ;;  %v1144_v54 = vpop.f32.mrb[11].mxu1 }
 0x1d4   :  { %1231 = vrcp.f32 %v755_v50 }
 0x1d5   :  { %v1226_v55 = vpop.eup %1225  ;;  %v713_v56 = vmul.f32 1.442695, %v684_v52  ;;  %v660_v57 = vand.u32 2147483647, %v1778_v53  ;;  %vm810_vm9 = vcmp.ge.f32.partialorder %v1778_v53, 0.0 }
 0x1d6   :  { %v756_v58 = vadd.f32 1.0, %v1226_v55  ;;  %v561_v59 = vpop.f32.mrb[12].mxu1  ;;  %v831_v23 = vsel %vm806_vm5, 1.0, %v1226_v55 }
 0x1d7   :  { %1233 = vpow2.f32 %v713_v56  ;;  %v685_v60 = vsub.f32 0.0, %v660_v57  ;;  %v1782_v61 = vadd.f32 %v1755_v21, %v561_v59  ;;  %v1147_v62 = vpop.f32.mrb[13].mxu1 }
 0x1d8   :  { %1235 = vrcp.f32 %v756_v58 }
 0x1d9   :  { %v1228_v63 = vpop.eup %1227  ;;  %v715_v0 = vmul.f32 1.442695, %v685_v60  ;;  %v661_v1 = vand.u32 2147483647, %v1782_v61  ;;  %vm811_vm10 = vcmp.ge.f32.partialorder %v1782_v61, 0.0 }
 0x1da   :  { %v757_v2 = vadd.f32 1.0, %v1228_v63  ;;  %v566_v3 = vpop.f32.mrb[14].mxu1  ;;  %v832_v34 = vsel %vm807_vm6, 1.0, %v1228_v63 }
 0x1db   :  { %1237 = vpow2.f32 %v715_v0  ;;  %v686_v5 = vsub.f32 0.0, %v661_v1  ;;  %v1786_v6 = vadd.f32 %v1755_v21, %v566_v3  ;;  %v1150_v7 = vpop.f32.mrb[15].mxu1 }
 0x1dc   :  { %1239 = vrcp.f32 %v757_v2 }
 0x1dd   :  { %v1230_v8 = vpop.eup %1229  ;;  %v717_v9 = vmul.f32 1.442695, %v686_v5  ;;  %v662_v10 = vand.u32 2147483647, %v1786_v6  ;;  %vm812_vm11 = vcmp.ge.f32.partialorder %v1786_v6, 0.0 }
 0x1de   :  { %v1232_v11 = vpop.eup %1231  ;;  %v758_v13 = vadd.f32 1.0, %v1230_v8  ;;  %v571_v14 = vpop.f32.mrb[16].mxu1  ;;  %v833_v47 = vsel %vm808_vm7, 1.0, %v1230_v8 }
 0x1df   :  { %v855_v15 = vmul.f32 %v1232_v11, %v830_v12  ;;  %1241 = vpow2.f32 %v717_v9  ;;  %v687_v16 = vsub.f32 0.0, %v662_v10  ;;  %v1791_v17 = vadd.f32 %v1755_v21, %v571_v14  ;;  %v1153_v18 = vpop.f32.mrb[17].mxu1 }
 0x1e0   :  { %1243 = vrcp.f32 %v758_v13 }
 0x1e1   :  { %v1234_v19 = vpop.eup %1233  ;;  %881 = vst.msk [vmem:[%s1988_s5] sm:$0xff] %vm880_vm4, %v855_v15  ;;  %v719_v20 = vmul.f32 1.442695, %v687_v16  ;;  %v663_v45 = vand.u32 2147483647, %v1791_v17  ;;  %vm813_vm12 = vcmp.ge.f32.partialorder %v1791_v17, 0.0 }
 0x1e2   :  { %v1236_v22 = vpop.eup %1235  ;;  %v759_v4 = vadd.f32 1.0, %v1234_v19  ;;  %v576_v24 = vpop.f32.mrb[18].mxu1  ;;  %v834_v58 = vsel %vm809_vm8, 1.0, %v1234_v19 }
 0x1e3   :  { %v856_v25 = vmul.f32 %v1236_v22, %v831_v23  ;;  %1245 = vpow2.f32 %v719_v20  ;;  %v688_v27 = vsub.f32 0.0, %v663_v45  ;;  %v1800_v28 = vadd.f32 %v1755_v21, %v576_v24  ;;  %v1156_v29 = vpop.f32.mrb[19].mxu1 }
 0x1e4   :  { %1247 = vrcp.f32 %v759_v4 }
 0x1e5   :  { %v1238_v30 = vpop.eup %1237  ;;  %882 = vst.msk [vmem:[%s1988_s5 + $0x8] sm:$0xff] %vm880_vm4, %v856_v25  ;;  %v721_v26 = vmul.f32 1.442695, %v688_v27  ;;  %v664_v31 = vand.u32 2147483647, %v1800_v28  ;;  %vm814_vm13 = vcmp.ge.f32.partialorder %v1800_v28, 0.0 }
 0x1e6   :  { %v1240_v33 = vpop.eup %1239  ;;  %v760_v35 = vadd.f32 1.0, %v1238_v30  ;;  %v581_v36 = vpop.f32.mrb[20].mxu1  ;;  %v835_v7 = vsel %vm810_vm9, 1.0, %v1238_v30 }
 0x1e7   :  { %v857_v37 = vmul.f32 %v1240_v33, %v832_v34  ;;  %1249 = vpow2.f32 %v721_v26  ;;  %v689_v39 = vsub.f32 0.0, %v664_v31  ;;  %v1809_v40 = vadd.f32 %v1755_v21, %v581_v36  ;;  %v1159_v41 = vpop.f32.mrb[21].mxu1 }
 0x1e8   :  { %1251 = vrcp.f32 %v760_v35 }
 0x1e9   :  { %v1242_v42 = vpop.eup %1241  ;;  %883 = vst.msk [vmem:[%s1988_s5 + $0x10] sm:$0xff] %vm880_vm4, %v857_v37  ;;  %v723_v32 = vmul.f32 1.442695, %v689_v39  ;;  %v665_v43 = vand.u32 2147483647, %v1809_v40  ;;  %vm815_vm14 = vcmp.ge.f32.partialorder %v1809_v40, 0.0 }
 0x1ea   :  { %v1244_v46 = vpop.eup %1243  ;;  %v761_v48 = vadd.f32 1.0, %v1242_v42  ;;  %v586_v49 = vpop.f32.mrb[22].mxu1  ;;  %v836_v18 = vsel %vm811_vm10, 1.0, %v1242_v42 }
 0x1eb   :  { %v858_v50 = vmul.f32 %v1244_v46, %v833_v47  ;;  %1253 = vpow2.f32 %v723_v32  ;;  %v690_v51 = vsub.f32 0.0, %v665_v43  ;;  %v1818_v52 = vadd.f32 %v1755_v21, %v586_v49  ;;  %v1162_v54 = vpop.f32.mrb[23].mxu1 }
 0x1ec   :  { %1255 = vrcp.f32 %v761_v48 }
 0x1ed   :  { %v1246_v55 = vpop.eup %1245  ;;  %884 = vst.msk [vmem:[%s1988_s5 + $0x18] sm:$0xff] %vm880_vm4, %v858_v50  ;;  %v725_v38 = vmul.f32 1.442695, %v690_v51  ;;  %v666_v56 = vand.u32 2147483647, %v1818_v52  ;;  %vm816_vm15 = vcmp.ge.f32.partialorder %v1818_v52, 0.0 }
 0x1ee   :  { %v1248_v57 = vpop.eup %1247  ;;  %v762_v59 = vadd.f32 1.0, %v1246_v55  ;;  %v591_v60 = vpop.f32.mrb[24].mxu1  ;;  %v837_v29 = vsel %vm812_vm11, 1.0, %v1246_v55 }
 0x1ef   :  { %v859_v62 = vmul.f32 %v1248_v57, %v834_v58  ;;  %1257 = vpow2.f32 %v725_v38  ;;  %v691_v63 = vsub.f32 0.0, %v666_v56  ;;  %v1827_v0 = vadd.f32 %v1755_v21, %v591_v60  ;;  %v1165_v1 = vpop.f32.mrb[25].mxu1 }
 0x1f0   :  { %1259 = vrcp.f32 %v762_v59 }
 0x1f1   :  { %v1250_v2 = vpop.eup %1249  ;;  %885 = vst.msk [vmem:[%s1988_s5 + $0x20] sm:$0xff] %vm880_vm4, %v859_v62  ;;  %v727_v44 = vmul.f32 1.442695, %v691_v63  ;;  %v667_v3 = vand.u32 2147483647, %v1827_v0  ;;  %vm817_vm0 = vcmp.ge.f32.partialorder %v1827_v0, 0.0 }
 0x1f2   :  { %v1252_v5 = vpop.eup %1251  ;;  %v763_v8 = vadd.f32 1.0, %v1250_v2  ;;  %v596_v9 = vpop.f32.mrb[26].mxu1  ;;  %v838_v41 = vsel %vm813_vm12, 1.0, %v1250_v2 }
 0x1f3   :  { %v860_v10 = vmul.f32 %v1252_v5, %v835_v7  ;;  %1261 = vpow2.f32 %v727_v44  ;;  %v692_v11 = vsub.f32 0.0, %v667_v3  ;;  %v1836_v12 = vadd.f32 %v1755_v21, %v596_v9  ;;  %v1168_v13 = vpop.f32.mrb[27].mxu1 }
 0x1f4   :  { %1263 = vrcp.f32 %v763_v8 }
 0x1f5   :  { %v1254_v14 = vpop.eup %1253  ;;  %886 = vst.msk [vmem:[%s1988_s5 + $0x28] sm:$0xff] %vm880_vm4, %v860_v10  ;;  %v729_v53 = vmul.f32 1.442695, %v692_v11  ;;  %v668_v15 = vand.u32 2147483647, %v1836_v12  ;;  %vm818_vm1 = vcmp.ge.f32.partialorder %v1836_v12, 0.0 }
 0x1f6   :  { %v1256_v16 = vpop.eup %1255  ;;  %v764_v19 = vadd.f32 1.0, %v1254_v14  ;;  %v601_v20 = vpop.f32.mrb[28].mxu1  ;;  %v839_v54 = vsel %vm814_vm13, 1.0, %v1254_v14 }
 0x1f7   :  { %v861_v45 = vmul.f32 %v1256_v16, %v836_v18  ;;  %1265 = vpow2.f32 %v729_v53  ;;  %v693_v22 = vsub.f32 0.0, %v668_v15  ;;  %v1845_v23 = vadd.f32 %v1755_v21, %v601_v20  ;;  %v1171_v4 = vpop.f32.mrb[29].mxu1 }
 0x1f8   :  { %1267 = vrcp.f32 %v764_v19 }
 0x1f9   :  { %v1258_v24 = vpop.eup %1257  ;;  %887 = vst.msk [vmem:[%s1988_s5 + $0x30] sm:$0xff] %vm880_vm4, %v861_v45  ;;  %v731_v61 = vmul.f32 1.442695, %v693_v22  ;;  %v669_v25 = vand.u32 2147483647, %v1845_v23  ;;  %vm819_vm2 = vcmp.ge.f32.partialorder %v1845_v23, 0.0 }
 0x1fa   :  { %v1260_v27 = vpop.eup %1259  ;;  %v765_v30 = vadd.f32 1.0, %v1258_v24  ;;  %v606_v26 = vpop.f32.mrb[30].mxu1  ;;  %v840_v1 = vsel %vm815_vm14, 1.0, %v1258_v24 }
 0x1fb   :  { %v862_v31 = vmul.f32 %v1260_v27, %v837_v29  ;;  %1269 = vpow2.f32 %v731_v61  ;;  %v694_v33 = vsub.f32 0.0, %v669_v25  ;;  %v1854_v34 = vadd.f32 %v1755_v21, %v606_v26  ;;  %v1174_v35 = vpop.f32.mrb[31].mxu1 }
 0x1fc   :  { %1271 = vrcp.f32 %v765_v30 }
 0x1fd   :  { %v1262_v36 = vpop.eup %1261  ;;  %888 = vst.msk [vmem:[%s1988_s5 + $0x38] sm:$0xff] %vm880_vm4, %v862_v31  ;;  %v733_v6 = vmul.f32 1.442695, %v694_v33  ;;  %v670_v37 = vand.u32 2147483647, %v1854_v34  ;;  %vm820_vm3 = vcmp.ge.f32.partialorder %v1854_v34, 0.0 }
 0x1fe   :  { %v1264_v39 = vpop.eup %1263  ;;  %v766_v42 = vadd.f32 1.0, %v1262_v36  ;;  %v611_v32 = vpop.f32.mrb[32].mxu1  ;;  %v841_v13 = vsel %vm816_vm15, 1.0, %v1262_v36 }
 0x1ff   :  { %v863_v43 = vmul.f32 %v1264_v39, %v838_v41  ;;  %1273 = vpow2.f32 %v733_v6  ;;  %v695_v46 = vsub.f32 0.0, %v670_v37  ;;  %v1863_v47 = vadd.f32 %v1755_v21, %v611_v32  ;;  %v1177_v48 = vpop.f32.mrb[33].mxu1 }
 0x200   :  { %1275 = vrcp.f32 %v766_v42 }
 0x201   :  { %v1266_v49 = vpop.eup %1265  ;;  %889 = vst.msk [vmem:[%s1988_s5 + $0x40] sm:$0xff] %vm880_vm4, %v863_v43  ;;  %v735_v17 = vmul.f32 1.442695, %v695_v46  ;;  %v671_v50 = vand.u32 2147483647, %v1863_v47  ;;  %vm821_vm5 = vcmp.ge.f32.partialorder %v1863_v47, 0.0 }
 0x202   :  { %v1268_v51 = vpop.eup %1267  ;;  %v767_v55 = vadd.f32 1.0, %v1266_v49  ;;  %v616_v38 = vpop.f32.mrb[34].mxu1  ;;  %v842_v4 = vsel %vm817_vm0, 1.0, %v1266_v49 }
 0x203   :  { %v864_v56 = vmul.f32 %v1268_v51, %v839_v54  ;;  %1277 = vpow2.f32 %v735_v17  ;;  %v696_v57 = vsub.f32 0.0, %v671_v50  ;;  %v1872_v58 = vadd.f32 %v1755_v21, %v616_v38  ;;  %v1180_v59 = vpop.f32.mrb[35].mxu1 }
 0x204   :  { %1279 = vrcp.f32 %v767_v55 }
 0x205   :  { %v1270_v60 = vpop.eup %1269  ;;  %890 = vst.msk [vmem:[%s1988_s5 + $0x48] sm:$0xff] %vm880_vm4, %v864_v56  ;;  %v737_v28 = vmul.f32 1.442695, %v696_v57  ;;  %v672_v62 = vand.u32 2147483647, %v1872_v58  ;;  %vm822_vm6 = vcmp.ge.f32.partialorder %v1872_v58, 0.0 }
 0x206   :  { %v1272_v63 = vpop.eup %1271  ;;  %v768_v2 = vadd.f32 1.0, %v1270_v60  ;;  %v621_v44 = vpop.f32.mrb[36].mxu1  ;;  %v843_v35 = vsel %vm818_vm1, 1.0, %v1270_v60 }
 0x207   :  { %v865_v3 = vmul.f32 %v1272_v63, %v840_v1  ;;  %1281 = vpow2.f32 %v737_v28  ;;  %v697_v5 = vsub.f32 0.0, %v672_v62  ;;  %v1881_v7 = vadd.f32 %v1755_v21, %v621_v44  ;;  %v1183_v8 = vpop.f32.mrb[37].mxu1 }
 0x208   :  { %1283 = vrcp.f32 %v768_v2 }
 0x209   :  { %v1274_v9 = vpop.eup %1273  ;;  %891 = vst.msk [vmem:[%s1988_s5 + $0x50] sm:$0xff] %vm880_vm4, %v865_v3  ;;  %v739_v40 = vmul.f32 1.442695, %v697_v5  ;;  %v673_v10 = vand.u32 2147483647, %v1881_v7  ;;  %vm823_vm7 = vcmp.ge.f32.partialorder %v1881_v7, 0.0 }
 0x20a   :  { %v1276_v11 = vpop.eup %1275  ;;  %v769_v14 = vadd.f32 1.0, %v1274_v9  ;;  %v626_v53 = vpop.f32.mrb[38].mxu1  ;;  %v844_v48 = vsel %vm819_vm2, 1.0, %v1274_v9 }
 0x20b   :  { %v866_v15 = vmul.f32 %v1276_v11, %v841_v13  ;;  %1285 = vpow2.f32 %v739_v40  ;;  %v698_v16 = vsub.f32 0.0, %v673_v10  ;;  %v1890_v18 = vadd.f32 %v1755_v21, %v626_v53  ;;  %v1186_v19 = vpop.f32.mrb[39].mxu1 }
 0x20c   :  { %1287 = vrcp.f32 %v769_v14 }
 0x20d   :  { %v1278_v20 = vpop.eup %1277  ;;  %892 = vst.msk [vmem:[%s1988_s5 + $0x58] sm:$0xff] %vm880_vm4, %v866_v15  ;;  %v741_v52 = vmul.f32 1.442695, %v698_v16  ;;  %v674_v45 = vand.u32 2147483647, %v1890_v18  ;;  %vm824_vm8 = vcmp.ge.f32.partialorder %v1890_v18, 0.0 }
 0x20e   :  { %v1280_v22 = vpop.eup %1279  ;;  %v770_v24 = vadd.f32 1.0, %v1278_v20  ;;  %v631_v61 = vpop.f32.mrb[40].mxu1  ;;  %v845_v59 = vsel %vm820_vm3, 1.0, %v1278_v20 }
 0x20f   :  { %v867_v25 = vmul.f32 %v1280_v22, %v842_v4  ;;  %1289 = vpow2.f32 %v741_v52  ;;  %v699_v27 = vsub.f32 0.0, %v674_v45  ;;  %v1899_v29 = vadd.f32 %v1755_v21, %v631_v61  ;;  %v1189_v30 = vpop.f32.mrb[41].mxu1 }
 0x210   :  { %1291 = vrcp.f32 %v770_v24 }
 0x211   :  { %v1282_v26 = vpop.eup %1281  ;;  %893 = vst.msk [vmem:[%s1988_s5 + $0x60] sm:$0xff] %vm880_vm4, %v867_v25  ;;  %v743_v0 = vmul.f32 1.442695, %v699_v27  ;;  %v675_v31 = vand.u32 2147483647, %v1899_v29  ;;  %vm825_vm9 = vcmp.ge.f32.partialorder %v1899_v29, 0.0 }
 0x212   :  { %v1284_v33 = vpop.eup %1283  ;;  %v771_v36 = vadd.f32 1.0, %v1282_v26  ;;  %v636_v6 = vpop.f32.mrb[42].mxu1  ;;  %v846_v8 = vsel %vm821_vm5, 1.0, %v1282_v26 }
 0x213   :  { %v868_v37 = vmul.f32 %v1284_v33, %v843_v35  ;;  %1293 = vpow2.f32 %v743_v0  ;;  %v700_v39 = vsub.f32 0.0, %v675_v31  ;;  %v1908_v41 = vadd.f32 %v1755_v21, %v636_v6  ;;  %v1192_v42 = vpop.f32.mrb[43].mxu1 }
 0x214   :  { %1295 = vrcp.f32 %v771_v36 }
 0x215   :  { %v1286_v32 = vpop.eup %1285  ;;  %894 = vst.msk [vmem:[%s1988_s5 + $0x68] sm:$0xff] %vm880_vm4, %v868_v37  ;;  %v745_v12 = vmul.f32 1.442695, %v700_v39  ;;  %v676_v43 = vand.u32 2147483647, %v1908_v41  ;;  %vm826_vm10 = vcmp.ge.f32.partialorder %v1908_v41, 0.0 }
 0x216   :  { %v1288_v46 = vpop.eup %1287  ;;  %v772_v49 = vadd.f32 1.0, %v1286_v32  ;;  %v641_v17 = vpop.f32.mrb[44].mxu1  ;;  %v847_v19 = vsel %vm822_vm6, 1.0, %v1286_v32 }
 0x217   :  { %v869_v50 = vmul.f32 %v1288_v46, %v844_v48  ;;  %1297 = vpow2.f32 %v745_v12  ;;  %v701_v51 = vsub.f32 0.0, %v676_v43  ;;  %v1917_v54 = vadd.f32 %v1755_v21, %v641_v17  ;;  %v1195_v55 = vpop.f32.mrb[45].mxu1 }
 0x218   :  { %1299 = vrcp.f32 %v772_v49 }
 0x219   :  { %v1290_v38 = vpop.eup %1289  ;;  %895 = vst.msk [vmem:[%s1988_s5 + $0x70] sm:$0xff] %vm880_vm4, %v869_v50  ;;  %v747_v23 = vmul.f32 1.442695, %v701_v51  ;;  %v677_v56 = vand.u32 2147483647, %v1917_v54  ;;  %vm827_vm11 = vcmp.ge.f32.partialorder %v1917_v54, 0.0 }
 0x21a   :  { %v1292_v57 = vpop.eup %1291  ;;  %v773_v60 = vadd.f32 1.0, %v1290_v38  ;;  %v646_v28 = vpop.f32.mrb[46].mxu1  ;;  %v848_v4 = vsel %vm823_vm7, 1.0, %v1290_v38 }
 0x21b   :  { %v870_v62 = vmul.f32 %v1292_v57, %v845_v59  ;;  %1301 = vpow2.f32 %v747_v23  ;;  %v702_v63 = vsub.f32 0.0, %v677_v56  ;;  %v1926_v1 = vadd.f32 %v1755_v21, %v646_v28  ;;  %v1198_v2 = vpop.f32.mrb[47].mxu1 }
 0x21c   :  { %1303 = vrcp.f32 %v773_v60 }
 0x21d   :  { %v1294_v44 = vpop.eup %1293  ;;  %896 = vst.msk [vmem:[%s1988_s5 + $0x78] sm:$0xff] %vm880_vm4, %v870_v62  ;;  %v749_v34 = vmul.f32 1.442695, %v702_v63  ;;  %v678_v3 = vand.u32 2147483647, %v1926_v1  ;;  %vm828_vm12 = vcmp.ge.f32.partialorder %v1926_v1, 0.0 }
 0x21e   :  { %v1296_v5 = vpop.eup %1295  ;;  %v774_v9 = vadd.f32 1.0, %v1294_v44  ;;  %v651_v40 = vpop.f32.mrb[48].mxu1  ;;  %v849_v30 = vsel %vm824_vm8, 1.0, %v1294_v44 }
 0x21f   :  { %v871_v10 = vmul.f32 %v1296_v5, %v846_v8  ;;  %1305 = vpow2.f32 %v749_v34  ;;  %v703_v11 = vsub.f32 0.0, %v678_v3  ;;  %v1935_v13 = vadd.f32 %v1755_v21, %v651_v40  ;;  %v1201_v14 = vpop.f32.mrb[49].mxu1 }
 0x220   :  { %1307 = vrcp.f32 %v774_v9 }
 0x221   :  { %v1298_v53 = vpop.eup %1297  ;;  %897 = vst.msk [vmem:[%s1988_s5 + $0x80] sm:$0xff] %vm880_vm4, %v871_v10  ;;  %v751_v47 = vmul.f32 1.442695, %v703_v11  ;;  %v679_v15 = vand.u32 2147483647, %v1935_v13  ;;  %vm829_vm13 = vcmp.ge.f32.partialorder %v1935_v13, 0.0 }
 0x222   :  { %v1300_v16 = vpop.eup %1299  ;;  %v775_v20 = vadd.f32 1.0, %v1298_v53  ;;  %v850_v33 = vsel %vm825_vm9, 1.0, %v1298_v53 }
 0x223   :  { %v872_v52 = vmul.f32 %v1300_v16, %v847_v19  ;;  %1309 = vpow2.f32 %v751_v47  ;;  %v704_v21 = vsub.f32 0.0, %v679_v15 }
 0x224   :  { %1311 = vrcp.f32 %v775_v20 }
 0x225   :  { %v1302_v45 = vpop.eup %1301  ;;  %898 = vst.msk [vmem:[%s1988_s5 + $0x88] sm:$0xff] %vm880_vm4, %v872_v52  ;;  %v753_v22 = vmul.f32 1.442695, %v704_v21 }
 0x226   :  { %v1304_v58 = vpop.eup %1303  ;;  %v776_v24 = vadd.f32 1.0, %v1302_v45  ;;  %v851_v37 = vsel %vm826_vm10, 1.0, %v1302_v45 }
 0x227   :  { %v873_v61 = vmul.f32 %v1304_v58, %v848_v4  ;;  %1313 = vpow2.f32 %v753_v22 }
 0x228   :  { %1315 = vrcp.f32 %v776_v24 }
 0x229   :  { %v1306_v25 = vpop.eup %1305  ;;  %899 = vst.msk [vmem:[%s1988_s5 + $0x90] sm:$0xff] %vm880_vm4, %v873_v61 }
 0x22a   :  { %v1308_v27 = vpop.eup %1307  ;;  %v777_v26 = vadd.f32 1.0, %v1306_v25  ;;  %v852_v32 = vsel %vm827_vm11, 1.0, %v1306_v25 }
 0x22b   :  { %v874_v0 = vmul.f32 %v1308_v27, %v849_v30 }
 0x22c   :  { %1317 = vrcp.f32 %v777_v26 }
 0x22d   :  { %v1310_v7 = vpop.eup %1309  ;;  %900 = vst.msk [vmem:[%s1988_s5 + $0x98] sm:$0xff] %vm880_vm4, %v874_v0 }
 0x22e   :  { %v1312_v31 = vpop.eup %1311  ;;  %v778_v35 = vadd.f32 1.0, %v1310_v7  ;;  %v853_v43 = vsel %vm828_vm12, 1.0, %v1310_v7 }
 0x22f   :  { %v875_v36 = vmul.f32 %v1312_v31, %v850_v33 }
 0x230   :  { %1319 = vrcp.f32 %v778_v35 }
 0x231   :  { %v1314_v6 = vpop.eup %1313  ;;  %901 = vst.msk [vmem:[%s1988_s5 + $0xa0] sm:$0xff] %vm880_vm4, %v875_v36 }
 0x232   :  { %v1316_v18 = vpop.eup %1315  ;;  %v779_v39 = vadd.f32 1.0, %v1314_v6  ;;  %v854_v49 = vsel %vm829_vm13, 1.0, %v1314_v6 }
 0x233   :  { %v876_v42 = vmul.f32 %v1316_v18, %v851_v37 }
 0x234   :  { %1321 = vrcp.f32 %v779_v39 }
 0x235   :  { %902 = vst.msk [vmem:[%s1988_s5 + $0xa8] sm:$0xff] %vm880_vm4, %v876_v42 }
 0x236   :  { %v1318_v29 = vpop.eup %1317 }
 0x237   :  { %v877_v12 = vmul.f32 %v1318_v29, %v852_v32 }
 0x239   :  { %903 = vst.msk [vmem:[%s1988_s5 + $0xb0] sm:$0xff] %vm880_vm4, %v877_v12 }
 0x23a   :  { %v1320_v41 = vpop.eup %1319 }
 0x23b   :  { %v878_v46 = vmul.f32 %v1320_v41, %v853_v43 }
 0x23d   :  { %904 = vst.msk [vmem:[%s1988_s5 + $0xb8] sm:$0xff] %vm880_vm4, %v878_v46 }
 0x23e   :  { %v1322_v48 = vpop.eup %1321 }
 0x23f   :  { %v879_v17 = vmul.f32 %v1322_v48, %v854_v49 }
 0x241   :  { %905 = vst.msk [vmem:[%s1988_s5 + $0xc0] sm:$0xff] %vm880_vm4, %v879_v17 }

</bundles_post_ra>
